<compile_context>
chip_gen: v5e
topology: v5e:2x2
jax: 0.10.0
libtpu: 0.0.40
codegen_flags: <defaults>
</compile_context>

<pallas_src>
import functools

import jax
import jax.numpy as jnp
from jax.experimental import pallas as pl
from jax.experimental.pallas import tpu as pltpu

# ---------------- model configuration (small, ViT-like) ----------------
B = 2                        # batch
C = 3                        # input channels
IMG = 32                     # image height / width
PATCH = 16                   # patch size  -> 2x2 = 4 patches
HIDDEN = 32                  # transformer width  ("in_planes")
HEADS = 4
HEAD_DIM = HIDDEN // HEADS
MLP = 4 * HIDDEN
PROJ = 16                    # projection dim ("in_planes_proj")
LAYERS = 2
NPATCH = (IMG // PATCH) ** 2
SEQ = NPATCH + 1             # +1 CLS token
CPP = C * PATCH * PATCH      # flattened patch length (matches conv weight flatten)
BN_EPS = 1e-5
LN_EPS = 1e-5
OUT_PAD = 128                # lane-dense padded output width (>= HIDDEN + PROJ)
ATTN_SCALE = 1.0 / (HEAD_DIM ** 0.5)


# ============================ fused Pallas kernel ============================

def _ln(x, g, b, eps=LN_EPS):
    """Row-wise LayerNorm on a value x:[rows, D], g/b:[1, D]."""
    mean = jnp.mean(x, axis=-1, keepdims=True)
    xc = x - mean
    var = jnp.mean(xc * xc, axis=-1, keepdims=True)
    return xc * jax.lax.rsqrt(var + eps) * g + b


def _fused_kernel(
    patches_ref,                        # [1, NPATCH, CPP]   (this batch element)
    w_patch_ref,                        # [CPP, HIDDEN]      (conv1 as matmul, no bias)
    cls_ref,                            # [1, HIDDEN]
    pos_ref,                            # [SEQ, HIDDEN]
    ln_pre_g_ref, ln_pre_b_ref,         # [1, HIDDEN]
    ln1_g_ref, ln1_b_ref,               # [L, 1, HIDDEN]
    w_qkv_ref, b_qkv_ref,               # [L, HIDDEN, 3*HIDDEN], [L, 1, 3*HIDDEN]
    w_o_ref, b_o_ref,                   # [L, HIDDEN, HIDDEN],   [L, 1, HIDDEN]
    ln2_g_ref, ln2_b_ref,               # [L, 1, HIDDEN]
    w_fc1_ref, b_fc1_ref,               # [L, HIDDEN, MLP], [L, 1, MLP]
    w_fc2_ref, b_fc2_ref,               # [L, MLP, HIDDEN], [L, 1, HIDDEN]
    ln_post_g_ref, ln_post_b_ref,       # [1, HIDDEN]
    proj_ref,                           # [HIDDEN, PROJ]
    bn_scale_ref, bn_shift_ref,         # [1, HIDDEN]   (folded eval-mode BN)
    bnp_scale_ref, bnp_shift_ref,       # [1, PROJ]
    out_ref,                            # [1, 1, OUT_PAD]
    tok_scratch,                        # VMEM [SEQ, HIDDEN]
    attn_scratch,                       # VMEM [SEQ, HIDDEN]
):
    f32 = jnp.float32

    # ---- patch embedding: stride==kernel conv rewritten as one matmul ----
    patches = patches_ref[0]                                            # [NPATCH, CPP]
    emb = jnp.dot(patches, w_patch_ref[...], preferred_element_type=f32)

    # ---- prepend CLS token, add positional embedding ----
    tok_scratch[0:1, :] = cls_ref[...] + pos_ref[0:1, :]
    tok_scratch[1:SEQ, :] = emb + pos_ref[1:SEQ, :]

    # ---- ln_pre ----
    x = _ln(tok_scratch[...], ln_pre_g_ref[...], ln_pre_b_ref[...])     # [SEQ, HIDDEN]

    # ---- transformer blocks (pre-LN), statically unrolled ----
    for l in range(LAYERS):
        # --- attention sub-block ---
        h = _ln(x, ln1_g_ref[l], ln1_b_ref[l])
        qkv = jnp.dot(h, w_qkv_ref[l], preferred_element_type=f32) + b_qkv_ref[l]

        for hd in range(HEADS):
            q = qkv[:, hd * HEAD_DIM:(hd + 1) * HEAD_DIM]               # [SEQ, Dh]
            k = qkv[:, HIDDEN + hd * HEAD_DIM:HIDDEN + (hd + 1) * HEAD_DIM]
            v = qkv[:, 2 * HIDDEN + hd * HEAD_DIM:2 * HIDDEN + (hd + 1) * HEAD_DIM]

            # q @ k^T without an explicit transpose (contract last dims).
            s = jax.lax.dot_general(
                q, k, (((1,), (1,)), ((), ())),
                preferred_element_type=f32) * ATTN_SCALE                # [SEQ, SEQ]
            s = s - jnp.max(s, axis=-1, keepdims=True)
            p = jnp.exp(s)
            p = p * pl.reciprocal(jnp.sum(p, axis=-1, keepdims=True), approx=True)
            attn_scratch[:, hd * HEAD_DIM:(hd + 1) * HEAD_DIM] = jnp.dot(
                p, v, preferred_element_type=f32)

        o = jnp.dot(attn_scratch[...], w_o_ref[l],
                    preferred_element_type=f32) + b_o_ref[l]
        x = x + o

        # --- MLP sub-block (QuickGELU) ---
        h2 = _ln(x, ln2_g_ref[l], ln2_b_ref[l])
        m = jnp.dot(h2, w_fc1_ref[l], preferred_element_type=f32) + b_fc1_ref[l]
        m = m * (1.0 / (1.0 + jnp.exp(-1.702 * m)))                     # QuickGELU
        x = x + jnp.dot(m, w_fc2_ref[l], preferred_element_type=f32) + b_fc2_ref[l]

    # ---- head: CLS token -> ln_post -> @proj, eval-mode BN (folded), concat ----
    cls_tok = x[0:1, :]                                                 # [1, HIDDEN]
    feats = _ln(cls_tok, ln_post_g_ref[...], ln_post_b_ref[...])
    feats_proj = jnp.dot(feats, proj_ref[...], preferred_element_type=f32)

    feat = feats * bn_scale_ref[...] + bn_shift_ref[...]                # bottleneck
    feat_proj = feats_proj * bnp_scale_ref[...] + bnp_shift_ref[...]    # bottleneck_proj

    # lane-dense padded output slab [1, 1, 128]
    out_ref[0, :, 0:HIDDEN] = feat
    out_ref[0, :, HIDDEN:HIDDEN + PROJ] = feat_proj
    out_ref[0, :, HIDDEN + PROJ:OUT_PAD] = jnp.zeros(
        (1, OUT_PAD - HIDDEN - PROJ), f32)


# ============================ JAX glue ============================

def patchify(x):
    """NCHW -> [B, num_patches, C*p*p] (matches conv weight flatten order)."""
    b, c, h, w = x.shape
    hp, wp = h // PATCH, w // PATCH
    x = x.reshape(b, c, hp, PATCH, wp, PATCH)
    x = x.transpose(0, 2, 4, 1, 3, 5)                # [B, hp, wp, C, p, p]
    return x.reshape(b, hp * wp, c * PATCH * PATCH)


def _w_spec(a):
    """Full-array VMEM BlockSpec, constant across the batch grid axis."""
    nd = a.ndim
    return pl.BlockSpec(a.shape, lambda i, _nd=nd: (0,) * _nd)


@jax.jit
def clip_reid_image_only_forward(x, packed):
    """Pallas equivalent of CLIPReIDImageOnlyWrapper.forward (ViT-B-16 branch)."""
    b = x.shape[0]
    patches = patchify(x)                            # [B, NPATCH, CPP]

    in_specs = [pl.BlockSpec((1, NPATCH, CPP), lambda i: (i, 0, 0))]
    in_specs += [_w_spec(a) for a in packed]

    out3 = pl.pallas_call(
        _fused_kernel,
        out_shape=jax.ShapeDtypeStruct((b, 1, OUT_PAD), jnp.float32),
        grid=(b,),
        in_specs=in_specs,
        out_specs=pl.BlockSpec((1, 1, OUT_PAD), lambda i: (i, 0, 0)),
        scratch_shapes=[pltpu.VMEM((SEQ, HIDDEN), jnp.float32),
                        pltpu.VMEM((SEQ, HIDDEN), jnp.float32)],
        compiler_params=pltpu.CompilerParams(
            dimension_semantics=("parallel",)),       # v7x: one batch per TC
    )(patches, *packed)

    return out3.reshape(b, OUT_PAD)[:, :HIDDEN + PROJ]


# ============================ parameters ============================

def make_params(key):
    ks = iter(jax.random.split(key, 128))

    def nrm(shape, scale=0.02):
        return scale * jax.random.normal(next(ks), shape, dtype=jnp.float32)

    def layer_params():
        return dict(
            ln1_g=1.0 + nrm((HIDDEN,)), ln1_b=nrm((HIDDEN,)),
            w_qkv=nrm((HIDDEN, 3 * HIDDEN)), b_qkv=nrm((3 * HIDDEN,)),
            w_o=nrm((HIDDEN, HIDDEN)), b_o=nrm((HIDDEN,)),
            ln2_g=1.0 + nrm((HIDDEN,)), ln2_b=nrm((HIDDEN,)),
            w_fc1=nrm((HIDDEN, MLP)), b_fc1=nrm((MLP,)),
            w_fc2=nrm((MLP, HIDDEN)), b_fc2=nrm((HIDDEN,)),
        )

    encoder = dict(
        w_patch=nrm((CPP, HIDDEN)),                  # CLIP conv1 has no bias
        cls=nrm((HIDDEN,)),
        pos=nrm((SEQ, HIDDEN)),
        ln_pre_g=1.0 + nrm((HIDDEN,)), ln_pre_b=nrm((HIDDEN,)),
        layers=[layer_params() for _ in range(LAYERS)],
        ln_post_g=1.0 + nrm((HIDDEN,)), ln_post_b=nrm((HIDDEN,)),
        proj=nrm((HIDDEN, PROJ)),
    )

    def bn_params(d):                                # rows: gamma, beta, mean, var
        gamma = 1.0 + nrm((d,))
        beta = nrm((d,))
        mean = nrm((d,))
        var = 0.5 + jnp.abs(nrm((d,)))
        return jnp.stack([gamma, beta, mean, var], axis=0)

    return dict(encoder=encoder, bn=bn_params(HIDDEN), bn_proj=bn_params(PROJ))


def pack_params(params):
    """One-time packing into the flat kernel argument order: layer params stacked
    along a leading L axis, biases as [*, 1, N] rows, eval-mode BN folded to
    (scale, shift)."""
    enc = params["encoder"]

    def stack(name):
        return jnp.stack([lp[name] for lp in enc["layers"]], axis=0)

    def stack_row(name):
        return jnp.stack([lp[name].reshape(1, -1) for lp in enc["layers"]], axis=0)

    def fold_bn(p):                                  # p: [4, d]
        gamma, beta, mean, var = p[0], p[1], p[2], p[3]
        scale = gamma * jax.lax.rsqrt(var + BN_EPS)
        shift = beta - mean * scale
        return scale.reshape(1, -1), shift.reshape(1, -1)

    bn_scale, bn_shift = fold_bn(params["bn"])
    bnp_scale, bnp_shift = fold_bn(params["bn_proj"])

    return (
        enc["w_patch"],
        enc["cls"].reshape(1, HIDDEN),
        enc["pos"],
        enc["ln_pre_g"].reshape(1, HIDDEN), enc["ln_pre_b"].reshape(1, HIDDEN),
        stack_row("ln1_g"), stack_row("ln1_b"),
        stack("w_qkv"), stack_row("b_qkv"),
        stack("w_o"), stack_row("b_o"),
        stack_row("ln2_g"), stack_row("ln2_b"),
        stack("w_fc1"), stack_row("b_fc1"),
        stack("w_fc2"), stack_row("b_fc2"),
        enc["ln_post_g"].reshape(1, HIDDEN), enc["ln_post_b"].reshape(1, HIDDEN),
        enc["proj"],
        bn_scale, bn_shift, bnp_scale, bnp_shift,
    )


# ============================ main ============================

if __name__ == "__main__":
    key = jax.random.PRNGKey(0)
    k_params, k_x = jax.random.split(key)
    params = make_params(k_params)
    packed = pack_params(params)
    x = jax.random.normal(k_x, (B, C, IMG, IMG), dtype=jnp.float32)  # NCHW like PyTorch

    out = clip_reid_image_only_forward(x, packed)
    out = jax.block_until_ready(out)

    assert out.shape == (B, HIDDEN + PROJ), out.shape
    assert out.dtype == jnp.float32
    assert bool(jnp.all(jnp.isfinite(out)))
    print("KERNEL_OK")
</pallas_src>

<mosaic_0001>
module attributes {stable_mosaic.version = 11 : i64} {
  func.func @_fused_kernel(%arg0: i32, %arg1: memref<1x4x768xf32, #tpu.memory_space<vmem>>, %arg2: memref<768x32xf32, #tpu.memory_space<vmem>>, %arg3: memref<1x32xf32, #tpu.memory_space<vmem>>, %arg4: memref<5x32xf32, #tpu.memory_space<vmem>>, %arg5: memref<1x32xf32, #tpu.memory_space<vmem>>, %arg6: memref<1x32xf32, #tpu.memory_space<vmem>>, %arg7: memref<2x1x32xf32, #tpu.memory_space<vmem>>, %arg8: memref<2x1x32xf32, #tpu.memory_space<vmem>>, %arg9: memref<2x32x96xf32, #tpu.memory_space<vmem>>, %arg10: memref<2x1x96xf32, #tpu.memory_space<vmem>>, %arg11: memref<2x32x32xf32, #tpu.memory_space<vmem>>, %arg12: memref<2x1x32xf32, #tpu.memory_space<vmem>>, %arg13: memref<2x1x32xf32, #tpu.memory_space<vmem>>, %arg14: memref<2x1x32xf32, #tpu.memory_space<vmem>>, %arg15: memref<2x32x128xf32, #tpu.memory_space<vmem>>, %arg16: memref<2x1x128xf32, #tpu.memory_space<vmem>>, %arg17: memref<2x128x32xf32, #tpu.memory_space<vmem>>, %arg18: memref<2x1x32xf32, #tpu.memory_space<vmem>>, %arg19: memref<1x32xf32, #tpu.memory_space<vmem>>, %arg20: memref<1x32xf32, #tpu.memory_space<vmem>>, %arg21: memref<32x16xf32, #tpu.memory_space<vmem>>, %arg22: memref<1x32xf32, #tpu.memory_space<vmem>>, %arg23: memref<1x32xf32, #tpu.memory_space<vmem>>, %arg24: memref<1x16xf32, #tpu.memory_space<vmem>>, %arg25: memref<1x16xf32, #tpu.memory_space<vmem>>, %arg26: memref<1x1x128xf32, #tpu.memory_space<vmem>>, %arg27: memref<5x32xf32, #tpu.memory_space<vmem>>, %arg28: memref<5x32xf32, #tpu.memory_space<vmem>>) attributes {dimension_semantics = [#tpu.dimension_semantics<parallel>], iteration_bounds = array<i64: 2>, scalar_prefetch = 0 : i64, scratch_operands = 2 : i64, tpu.core_type = #tpu.core_type<tc>, window_params = [{transform_indices = @transform_0, window_bounds = array<i64: 1, 4, 768>}, {pipeline_mode = #tpu.pipeline_mode<synchronous>, transform_indices = @transform_1, window_bounds = array<i64: 768, 32>}, {pipeline_mode = #tpu.pipeline_mode<synchronous>, transform_indices = @transform_2, window_bounds = array<i64: 1, 32>}, {pipeline_mode = #tpu.pipeline_mode<synchronous>, transform_indices = @transform_3, window_bounds = array<i64: 5, 32>}, {pipeline_mode = #tpu.pipeline_mode<synchronous>, transform_indices = @transform_4, window_bounds = array<i64: 1, 32>}, {pipeline_mode = #tpu.pipeline_mode<synchronous>, transform_indices = @transform_5, window_bounds = array<i64: 1, 32>}, {pipeline_mode = #tpu.pipeline_mode<synchronous>, transform_indices = @transform_6, window_bounds = array<i64: 2, 1, 32>}, {pipeline_mode = #tpu.pipeline_mode<synchronous>, transform_indices = @transform_7, window_bounds = array<i64: 2, 1, 32>}, {pipeline_mode = #tpu.pipeline_mode<synchronous>, transform_indices = @transform_8, window_bounds = array<i64: 2, 32, 96>}, {pipeline_mode = #tpu.pipeline_mode<synchronous>, transform_indices = @transform_9, window_bounds = array<i64: 2, 1, 96>}, {pipeline_mode = #tpu.pipeline_mode<synchronous>, transform_indices = @transform_10, window_bounds = array<i64: 2, 32, 32>}, {pipeline_mode = #tpu.pipeline_mode<synchronous>, transform_indices = @transform_11, window_bounds = array<i64: 2, 1, 32>}, {pipeline_mode = #tpu.pipeline_mode<synchronous>, transform_indices = @transform_12, window_bounds = array<i64: 2, 1, 32>}, {pipeline_mode = #tpu.pipeline_mode<synchronous>, transform_indices = @transform_13, window_bounds = array<i64: 2, 1, 32>}, {pipeline_mode = #tpu.pipeline_mode<synchronous>, transform_indices = @transform_14, window_bounds = array<i64: 2, 32, 128>}, {pipeline_mode = #tpu.pipeline_mode<synchronous>, transform_indices = @transform_15, window_bounds = array<i64: 2, 1, 128>}, {pipeline_mode = #tpu.pipeline_mode<synchronous>, transform_indices = @transform_16, window_bounds = array<i64: 2, 128, 32>}, {pipeline_mode = #tpu.pipeline_mode<synchronous>, transform_indices = @transform_17, window_bounds = array<i64: 2, 1, 32>}, {pipeline_mode = #tpu.pipeline_mode<synchronous>, transform_indices = @transform_18, window_bounds = array<i64: 1, 32>}, {pipeline_mode = #tpu.pipeline_mode<synchronous>, transform_indices = @transform_19, window_bounds = array<i64: 1, 32>}, {pipeline_mode = #tpu.pipeline_mode<synchronous>, transform_indices = @transform_20, window_bounds = array<i64: 32, 16>}, {pipeline_mode = #tpu.pipeline_mode<synchronous>, transform_indices = @transform_21, window_bounds = array<i64: 1, 32>}, {pipeline_mode = #tpu.pipeline_mode<synchronous>, transform_indices = @transform_22, window_bounds = array<i64: 1, 32>}, {pipeline_mode = #tpu.pipeline_mode<synchronous>, transform_indices = @transform_23, window_bounds = array<i64: 1, 16>}, {pipeline_mode = #tpu.pipeline_mode<synchronous>, transform_indices = @transform_24, window_bounds = array<i64: 1, 16>}, {transform_indices = @transform_25, window_bounds = array<i64: 1, 1, 128>}]} {
    %c0 = arith.constant 0 : index
    %c0_0 = arith.constant 0 : index
    %c0_1 = arith.constant 0 : index
    %0 = vector.load %arg1[%c0, %c0_0, %c0_1] : memref<1x4x768xf32, #tpu.memory_space<vmem>>, vector<1x4x768xf32>
    %1 = vector.shape_cast %0 : vector<1x4x768xf32> to vector<4x768xf32>
    %c0_2 = arith.constant 0 : index
    %c0_3 = arith.constant 0 : index
    %2 = vector.load %arg2[%c0_2, %c0_3] : memref<768x32xf32, #tpu.memory_space<vmem>>, vector<768x32xf32>
    %cst = arith.constant dense<0.000000e+00> : vector<4x32xf32>
    %3 = tpu.matmul %1, %2, %cst {dimension_numbers = #tpu.dot_dimension_numbers<[1], [0], [0], [1], [0, 0, 1, 1], [], []>} : vector<4x768xf32>, vector<768x32xf32>, vector<4x32xf32> -> vector<4x32xf32>
    %c0_4 = arith.constant 0 : index
    %c0_5 = arith.constant 0 : index
    %4 = vector.load %arg3[%c0_4, %c0_5] : memref<1x32xf32, #tpu.memory_space<vmem>>, vector<1x32xf32>
    %c0_6 = arith.constant 0 : index
    %c0_7 = arith.constant 0 : index
    %5 = vector.load %arg4[%c0_6, %c0_7] : memref<5x32xf32, #tpu.memory_space<vmem>>, vector<1x32xf32>
    %6 = arith.addf %4, %5 : vector<1x32xf32>
    %c0_8 = arith.constant 0 : index
    %c0_9 = arith.constant 0 : index
    %7 = vector.load %arg27[%c0_8, %c0_9] : memref<5x32xf32, #tpu.memory_space<vmem>>, vector<1x32xf32>
    tpu.vector_store %arg27[%c0_8, %c0_9], %6 {strides = array<i32>} : memref<5x32xf32, #tpu.memory_space<vmem>>, vector<1x32xf32>,
    %c1 = arith.constant 1 : index
    %c0_10 = arith.constant 0 : index
    %8 = vector.load %arg4[%c1, %c0_10] : memref<5x32xf32, #tpu.memory_space<vmem>>, vector<4x32xf32>
    %9 = arith.addf %3, %8 : vector<4x32xf32>
    %c1_11 = arith.constant 1 : index
    %c0_12 = arith.constant 0 : index
    %10 = vector.load %arg27[%c1_11, %c0_12] : memref<5x32xf32, #tpu.memory_space<vmem>>, vector<4x32xf32>
    tpu.vector_store %arg27[%c1_11, %c0_12], %9 {strides = array<i32>} : memref<5x32xf32, #tpu.memory_space<vmem>>, vector<4x32xf32>,
    %c0_13 = arith.constant 0 : index
    %c0_14 = arith.constant 0 : index
    %11 = vector.load %arg27[%c0_13, %c0_14] : memref<5x32xf32, #tpu.memory_space<vmem>>, vector<5x32xf32>
    %c0_15 = arith.constant 0 : index
    %c0_16 = arith.constant 0 : index
    %12 = vector.load %arg5[%c0_15, %c0_16] : memref<1x32xf32, #tpu.memory_space<vmem>>, vector<1x32xf32>
    %c0_17 = arith.constant 0 : index
    %c0_18 = arith.constant 0 : index
    %13 = vector.load %arg6[%c0_17, %c0_18] : memref<1x32xf32, #tpu.memory_space<vmem>>, vector<1x32xf32>
    %cst_19 = arith.constant dense<0.000000e+00> : vector<5xf32>
    %14 = vector.multi_reduction <add>, %11, %cst_19 [1] : vector<5x32xf32> to vector<5xf32>
    %15 = vector.shape_cast %14 : vector<5xf32> to vector<5x1xf32>
    %cst_20 = arith.constant 3.200000e+01 : f32
    %16 = vector.broadcast %cst_20 : f32 to vector<5x1xf32>
    %17 = arith.divf %15, %16 : vector<5x1xf32>
    %18 = vector.broadcast %17 : vector<5x1xf32> to vector<5x32xf32>
    %19 = arith.subf %11, %18 : vector<5x32xf32>
    %20 = arith.mulf %19, %19 : vector<5x32xf32>
    %cst_21 = arith.constant dense<0.000000e+00> : vector<5xf32>
    %21 = vector.multi_reduction <add>, %20, %cst_21 [1] : vector<5x32xf32> to vector<5xf32>
    %22 = vector.shape_cast %21 : vector<5xf32> to vector<5x1xf32>
    %cst_22 = arith.constant 3.200000e+01 : f32
    %23 = vector.broadcast %cst_22 : f32 to vector<5x1xf32>
    %24 = arith.divf %22, %23 : vector<5x1xf32>
    %cst_23 = arith.constant 9.99999974E-6 : f32
    %25 = vector.broadcast %cst_23 : f32 to vector<5x1xf32>
    %26 = arith.addf %24, %25 : vector<5x1xf32>
    %27 = math.rsqrt %26 : vector<5x1xf32>
    %28 = vector.broadcast %27 : vector<5x1xf32> to vector<5x32xf32>
    %29 = arith.mulf %19, %28 : vector<5x32xf32>
    %30 = vector.broadcast %12 : vector<1x32xf32> to vector<5x32xf32>
    %31 = arith.mulf %29, %30 : vector<5x32xf32>
    %32 = vector.broadcast %13 : vector<1x32xf32> to vector<5x32xf32>
    %33 = arith.addf %31, %32 : vector<5x32xf32>
    %c0_24 = arith.constant 0 : index
    %c0_25 = arith.constant 0 : index
    %c0_26 = arith.constant 0 : index
    %34 = vector.load %arg7[%c0_24, %c0_25, %c0_26] : memref<2x1x32xf32, #tpu.memory_space<vmem>>, vector<1x1x32xf32>
    %35 = vector.shape_cast %34 : vector<1x1x32xf32> to vector<1x32xf32>
    %c0_27 = arith.constant 0 : index
    %c0_28 = arith.constant 0 : index
    %c0_29 = arith.constant 0 : index
    %36 = vector.load %arg8[%c0_27, %c0_28, %c0_29] : memref<2x1x32xf32, #tpu.memory_space<vmem>>, vector<1x1x32xf32>
    %37 = vector.shape_cast %36 : vector<1x1x32xf32> to vector<1x32xf32>
    %cst_30 = arith.constant dense<0.000000e+00> : vector<5xf32>
    %38 = vector.multi_reduction <add>, %33, %cst_30 [1] : vector<5x32xf32> to vector<5xf32>
    %39 = vector.shape_cast %38 : vector<5xf32> to vector<5x1xf32>
    %cst_31 = arith.constant 3.200000e+01 : f32
    %40 = vector.broadcast %cst_31 : f32 to vector<5x1xf32>
    %41 = arith.divf %39, %40 : vector<5x1xf32>
    %42 = vector.broadcast %41 : vector<5x1xf32> to vector<5x32xf32>
    %43 = arith.subf %33, %42 : vector<5x32xf32>
    %44 = arith.mulf %43, %43 : vector<5x32xf32>
    %cst_32 = arith.constant dense<0.000000e+00> : vector<5xf32>
    %45 = vector.multi_reduction <add>, %44, %cst_32 [1] : vector<5x32xf32> to vector<5xf32>
    %46 = vector.shape_cast %45 : vector<5xf32> to vector<5x1xf32>
    %cst_33 = arith.constant 3.200000e+01 : f32
    %47 = vector.broadcast %cst_33 : f32 to vector<5x1xf32>
    %48 = arith.divf %46, %47 : vector<5x1xf32>
    %cst_34 = arith.constant 9.99999974E-6 : f32
    %49 = vector.broadcast %cst_34 : f32 to vector<5x1xf32>
    %50 = arith.addf %48, %49 : vector<5x1xf32>
    %51 = math.rsqrt %50 : vector<5x1xf32>
    %52 = vector.broadcast %51 : vector<5x1xf32> to vector<5x32xf32>
    %53 = arith.mulf %43, %52 : vector<5x32xf32>
    %54 = vector.broadcast %35 : vector<1x32xf32> to vector<5x32xf32>
    %55 = arith.mulf %53, %54 : vector<5x32xf32>
    %56 = vector.broadcast %37 : vector<1x32xf32> to vector<5x32xf32>
    %57 = arith.addf %55, %56 : vector<5x32xf32>
    %c0_35 = arith.constant 0 : index
    %c0_36 = arith.constant 0 : index
    %c0_37 = arith.constant 0 : index
    %58 = vector.load %arg9[%c0_35, %c0_36, %c0_37] : memref<2x32x96xf32, #tpu.memory_space<vmem>>, vector<1x32x96xf32>
    %59 = vector.shape_cast %58 : vector<1x32x96xf32> to vector<32x96xf32>
    %cst_38 = arith.constant dense<0.000000e+00> : vector<5x96xf32>
    %60 = tpu.matmul %57, %59, %cst_38 {dimension_numbers = #tpu.dot_dimension_numbers<[1], [0], [0], [1], [0, 0, 1, 1], [], []>} : vector<5x32xf32>, vector<32x96xf32>, vector<5x96xf32> -> vector<5x96xf32>
    %c0_39 = arith.constant 0 : index
    %c0_40 = arith.constant 0 : index
    %c0_41 = arith.constant 0 : index
    %61 = vector.load %arg10[%c0_39, %c0_40, %c0_41] : memref<2x1x96xf32, #tpu.memory_space<vmem>>, vector<1x1x96xf32>
    %62 = vector.shape_cast %61 : vector<1x1x96xf32> to vector<1x96xf32>
    %63 = vector.broadcast %62 : vector<1x96xf32> to vector<5x96xf32>
    %64 = arith.addf %60, %63 : vector<5x96xf32>
    %65 = vector.extract_strided_slice %64 {offsets = [0, 0], sizes = [5, 8], strides = [1, 1]} : vector<5x96xf32> to vector<5x8xf32>
    %66 = vector.extract_strided_slice %64 {offsets = [0, 32], sizes = [5, 8], strides = [1, 1]} : vector<5x96xf32> to vector<5x8xf32>
    %67 = vector.extract_strided_slice %64 {offsets = [0, 64], sizes = [5, 8], strides = [1, 1]} : vector<5x96xf32> to vector<5x8xf32>
    %cst_42 = arith.constant dense<0.000000e+00> : vector<5x5xf32>
    %68 = tpu.matmul %65, %66, %cst_42 {dimension_numbers = #tpu.dot_dimension_numbers<[1], [1], [0], [0], [0, 0, 1, 0], [], []>} : vector<5x8xf32>, vector<5x8xf32>, vector<5x5xf32> -> vector<5x5xf32>
    %cst_43 = arith.constant 0.353553385 : f32
    %69 = vector.broadcast %cst_43 : f32 to vector<5x5xf32>
    %70 = arith.mulf %68, %69 : vector<5x5xf32>
    %cst_44 = arith.constant dense<0xFF800000> : vector<5xf32>
    %71 = vector.multi_reduction <maximumf>, %70, %cst_44 [1] : vector<5x5xf32> to vector<5xf32>
    %72 = vector.shape_cast %71 : vector<5xf32> to vector<5x1xf32>
    %73 = vector.broadcast %72 : vector<5x1xf32> to vector<5x5xf32>
    %74 = arith.subf %70, %73 : vector<5x5xf32>
    %75 = math.exp %74 : vector<5x5xf32>
    %cst_45 = arith.constant dense<0.000000e+00> : vector<5xf32>
    %76 = vector.multi_reduction <add>, %75, %cst_45 [1] : vector<5x5xf32> to vector<5xf32>
    %77 = vector.shape_cast %76 : vector<5xf32> to vector<5x1xf32>
    %78 = tpu.reciprocal %77 {approx = true} : vector<5x1xf32> -> vector<5x1xf32>
    %79 = vector.broadcast %78 : vector<5x1xf32> to vector<5x5xf32>
    %80 = arith.mulf %75, %79 : vector<5x5xf32>
    %cst_46 = arith.constant dense<0.000000e+00> : vector<5x8xf32>
    %81 = tpu.matmul %80, %67, %cst_46 {dimension_numbers = #tpu.dot_dimension_numbers<[1], [0], [0], [1], [0, 0, 1, 1], [], []>} : vector<5x5xf32>, vector<5x8xf32>, vector<5x8xf32> -> vector<5x8xf32>
    %c0_47 = arith.constant 0 : index
    %c0_48 = arith.constant 0 : index
    %82 = vector.load %arg28[%c0_47, %c0_48] : memref<5x32xf32, #tpu.memory_space<vmem>>, vector<5x8xf32>
    tpu.vector_store %arg28[%c0_47, %c0_48], %81 {strides = array<i32>} : memref<5x32xf32, #tpu.memory_space<vmem>>, vector<5x8xf32>,
    %83 = vector.extract_strided_slice %64 {offsets = [0, 8], sizes = [5, 8], strides = [1, 1]} : vector<5x96xf32> to vector<5x8xf32>
    %84 = vector.extract_strided_slice %64 {offsets = [0, 40], sizes = [5, 8], strides = [1, 1]} : vector<5x96xf32> to vector<5x8xf32>
    %85 = vector.extract_strided_slice %64 {offsets = [0, 72], sizes = [5, 8], strides = [1, 1]} : vector<5x96xf32> to vector<5x8xf32>
    %cst_49 = arith.constant dense<0.000000e+00> : vector<5x5xf32>
    %86 = tpu.matmul %83, %84, %cst_49 {dimension_numbers = #tpu.dot_dimension_numbers<[1], [1], [0], [0], [0, 0, 1, 0], [], []>} : vector<5x8xf32>, vector<5x8xf32>, vector<5x5xf32> -> vector<5x5xf32>
    %cst_50 = arith.constant 0.353553385 : f32
    %87 = vector.broadcast %cst_50 : f32 to vector<5x5xf32>
    %88 = arith.mulf %86, %87 : vector<5x5xf32>
    %cst_51 = arith.constant dense<0xFF800000> : vector<5xf32>
    %89 = vector.multi_reduction <maximumf>, %88, %cst_51 [1] : vector<5x5xf32> to vector<5xf32>
    %90 = vector.shape_cast %89 : vector<5xf32> to vector<5x1xf32>
    %91 = vector.broadcast %90 : vector<5x1xf32> to vector<5x5xf32>
    %92 = arith.subf %88, %91 : vector<5x5xf32>
    %93 = math.exp %92 : vector<5x5xf32>
    %cst_52 = arith.constant dense<0.000000e+00> : vector<5xf32>
    %94 = vector.multi_reduction <add>, %93, %cst_52 [1] : vector<5x5xf32> to vector<5xf32>
    %95 = vector.shape_cast %94 : vector<5xf32> to vector<5x1xf32>
    %96 = tpu.reciprocal %95 {approx = true} : vector<5x1xf32> -> vector<5x1xf32>
    %97 = vector.broadcast %96 : vector<5x1xf32> to vector<5x5xf32>
    %98 = arith.mulf %93, %97 : vector<5x5xf32>
    %cst_53 = arith.constant dense<0.000000e+00> : vector<5x8xf32>
    %99 = tpu.matmul %98, %85, %cst_53 {dimension_numbers = #tpu.dot_dimension_numbers<[1], [0], [0], [1], [0, 0, 1, 1], [], []>} : vector<5x5xf32>, vector<5x8xf32>, vector<5x8xf32> -> vector<5x8xf32>
    %c0_54 = arith.constant 0 : index
    %c8 = arith.constant 8 : index
    %100 = vector.load %arg28[%c0_54, %c8] : memref<5x32xf32, #tpu.memory_space<vmem>>, vector<5x8xf32>
    tpu.vector_store %arg28[%c0_54, %c8], %99 {strides = array<i32>} : memref<5x32xf32, #tpu.memory_space<vmem>>, vector<5x8xf32>,
    %101 = vector.extract_strided_slice %64 {offsets = [0, 16], sizes = [5, 8], strides = [1, 1]} : vector<5x96xf32> to vector<5x8xf32>
    %102 = vector.extract_strided_slice %64 {offsets = [0, 48], sizes = [5, 8], strides = [1, 1]} : vector<5x96xf32> to vector<5x8xf32>
    %103 = vector.extract_strided_slice %64 {offsets = [0, 80], sizes = [5, 8], strides = [1, 1]} : vector<5x96xf32> to vector<5x8xf32>
    %cst_55 = arith.constant dense<0.000000e+00> : vector<5x5xf32>
    %104 = tpu.matmul %101, %102, %cst_55 {dimension_numbers = #tpu.dot_dimension_numbers<[1], [1], [0], [0], [0, 0, 1, 0], [], []>} : vector<5x8xf32>, vector<5x8xf32>, vector<5x5xf32> -> vector<5x5xf32>
    %cst_56 = arith.constant 0.353553385 : f32
    %105 = vector.broadcast %cst_56 : f32 to vector<5x5xf32>
    %106 = arith.mulf %104, %105 : vector<5x5xf32>
    %cst_57 = arith.constant dense<0xFF800000> : vector<5xf32>
    %107 = vector.multi_reduction <maximumf>, %106, %cst_57 [1] : vector<5x5xf32> to vector<5xf32>
    %108 = vector.shape_cast %107 : vector<5xf32> to vector<5x1xf32>
    %109 = vector.broadcast %108 : vector<5x1xf32> to vector<5x5xf32>
    %110 = arith.subf %106, %109 : vector<5x5xf32>
    %111 = math.exp %110 : vector<5x5xf32>
    %cst_58 = arith.constant dense<0.000000e+00> : vector<5xf32>
    %112 = vector.multi_reduction <add>, %111, %cst_58 [1] : vector<5x5xf32> to vector<5xf32>
    %113 = vector.shape_cast %112 : vector<5xf32> to vector<5x1xf32>
    %114 = tpu.reciprocal %113 {approx = true} : vector<5x1xf32> -> vector<5x1xf32>
    %115 = vector.broadcast %114 : vector<5x1xf32> to vector<5x5xf32>
    %116 = arith.mulf %111, %115 : vector<5x5xf32>
    %cst_59 = arith.constant dense<0.000000e+00> : vector<5x8xf32>
    %117 = tpu.matmul %116, %103, %cst_59 {dimension_numbers = #tpu.dot_dimension_numbers<[1], [0], [0], [1], [0, 0, 1, 1], [], []>} : vector<5x5xf32>, vector<5x8xf32>, vector<5x8xf32> -> vector<5x8xf32>
    %c0_60 = arith.constant 0 : index
    %c16 = arith.constant 16 : index
    %118 = vector.load %arg28[%c0_60, %c16] : memref<5x32xf32, #tpu.memory_space<vmem>>, vector<5x8xf32>
    tpu.vector_store %arg28[%c0_60, %c16], %117 {strides = array<i32>} : memref<5x32xf32, #tpu.memory_space<vmem>>, vector<5x8xf32>,
    %119 = vector.extract_strided_slice %64 {offsets = [0, 24], sizes = [5, 8], strides = [1, 1]} : vector<5x96xf32> to vector<5x8xf32>
    %120 = vector.extract_strided_slice %64 {offsets = [0, 56], sizes = [5, 8], strides = [1, 1]} : vector<5x96xf32> to vector<5x8xf32>
    %121 = vector.extract_strided_slice %64 {offsets = [0, 88], sizes = [5, 8], strides = [1, 1]} : vector<5x96xf32> to vector<5x8xf32>
    %cst_61 = arith.constant dense<0.000000e+00> : vector<5x5xf32>
    %122 = tpu.matmul %119, %120, %cst_61 {dimension_numbers = #tpu.dot_dimension_numbers<[1], [1], [0], [0], [0, 0, 1, 0], [], []>} : vector<5x8xf32>, vector<5x8xf32>, vector<5x5xf32> -> vector<5x5xf32>
    %cst_62 = arith.constant 0.353553385 : f32
    %123 = vector.broadcast %cst_62 : f32 to vector<5x5xf32>
    %124 = arith.mulf %122, %123 : vector<5x5xf32>
    %cst_63 = arith.constant dense<0xFF800000> : vector<5xf32>
    %125 = vector.multi_reduction <maximumf>, %124, %cst_63 [1] : vector<5x5xf32> to vector<5xf32>
    %126 = vector.shape_cast %125 : vector<5xf32> to vector<5x1xf32>
    %127 = vector.broadcast %126 : vector<5x1xf32> to vector<5x5xf32>
    %128 = arith.subf %124, %127 : vector<5x5xf32>
    %129 = math.exp %128 : vector<5x5xf32>
    %cst_64 = arith.constant dense<0.000000e+00> : vector<5xf32>
    %130 = vector.multi_reduction <add>, %129, %cst_64 [1] : vector<5x5xf32> to vector<5xf32>
    %131 = vector.shape_cast %130 : vector<5xf32> to vector<5x1xf32>
    %132 = tpu.reciprocal %131 {approx = true} : vector<5x1xf32> -> vector<5x1xf32>
    %133 = vector.broadcast %132 : vector<5x1xf32> to vector<5x5xf32>
    %134 = arith.mulf %129, %133 : vector<5x5xf32>
    %cst_65 = arith.constant dense<0.000000e+00> : vector<5x8xf32>
    %135 = tpu.matmul %134, %121, %cst_65 {dimension_numbers = #tpu.dot_dimension_numbers<[1], [0], [0], [1], [0, 0, 1, 1], [], []>} : vector<5x5xf32>, vector<5x8xf32>, vector<5x8xf32> -> vector<5x8xf32>
    %c0_66 = arith.constant 0 : index
    %c24 = arith.constant 24 : index
    %136 = vector.load %arg28[%c0_66, %c24] : memref<5x32xf32, #tpu.memory_space<vmem>>, vector<5x8xf32>
    tpu.vector_store %arg28[%c0_66, %c24], %135 {strides = array<i32>} : memref<5x32xf32, #tpu.memory_space<vmem>>, vector<5x8xf32>,
    %c0_67 = arith.constant 0 : index
    %c0_68 = arith.constant 0 : index
    %137 = vector.load %arg28[%c0_67, %c0_68] : memref<5x32xf32, #tpu.memory_space<vmem>>, vector<5x32xf32>
    %c0_69 = arith.constant 0 : index
    %c0_70 = arith.constant 0 : index
    %c0_71 = arith.constant 0 : index
    %138 = vector.load %arg11[%c0_69, %c0_70, %c0_71] : memref<2x32x32xf32, #tpu.memory_space<vmem>>, vector<1x32x32xf32>
    %139 = vector.shape_cast %138 : vector<1x32x32xf32> to vector<32x32xf32>
    %cst_72 = arith.constant dense<0.000000e+00> : vector<5x32xf32>
    %140 = tpu.matmul %137, %139, %cst_72 {dimension_numbers = #tpu.dot_dimension_numbers<[1], [0], [0], [1], [0, 0, 1, 1], [], []>} : vector<5x32xf32>, vector<32x32xf32>, vector<5x32xf32> -> vector<5x32xf32>
    %c0_73 = arith.constant 0 : index
    %c0_74 = arith.constant 0 : index
    %c0_75 = arith.constant 0 : index
    %141 = vector.load %arg12[%c0_73, %c0_74, %c0_75] : memref<2x1x32xf32, #tpu.memory_space<vmem>>, vector<1x1x32xf32>
    %142 = vector.shape_cast %141 : vector<1x1x32xf32> to vector<1x32xf32>
    %143 = vector.broadcast %142 : vector<1x32xf32> to vector<5x32xf32>
    %144 = arith.addf %140, %143 : vector<5x32xf32>
    %145 = arith.addf %33, %144 : vector<5x32xf32>
    %c0_76 = arith.constant 0 : index
    %c0_77 = arith.constant 0 : index
    %c0_78 = arith.constant 0 : index
    %146 = vector.load %arg13[%c0_76, %c0_77, %c0_78] : memref<2x1x32xf32, #tpu.memory_space<vmem>>, vector<1x1x32xf32>
    %147 = vector.shape_cast %146 : vector<1x1x32xf32> to vector<1x32xf32>
    %c0_79 = arith.constant 0 : index
    %c0_80 = arith.constant 0 : index
    %c0_81 = arith.constant 0 : index
    %148 = vector.load %arg14[%c0_79, %c0_80, %c0_81] : memref<2x1x32xf32, #tpu.memory_space<vmem>>, vector<1x1x32xf32>
    %149 = vector.shape_cast %148 : vector<1x1x32xf32> to vector<1x32xf32>
    %cst_82 = arith.constant dense<0.000000e+00> : vector<5xf32>
    %150 = vector.multi_reduction <add>, %145, %cst_82 [1] : vector<5x32xf32> to vector<5xf32>
    %151 = vector.shape_cast %150 : vector<5xf32> to vector<5x1xf32>
    %cst_83 = arith.constant 3.200000e+01 : f32
    %152 = vector.broadcast %cst_83 : f32 to vector<5x1xf32>
    %153 = arith.divf %151, %152 : vector<5x1xf32>
    %154 = vector.broadcast %153 : vector<5x1xf32> to vector<5x32xf32>
    %155 = arith.subf %145, %154 : vector<5x32xf32>
    %156 = arith.mulf %155, %155 : vector<5x32xf32>
    %cst_84 = arith.constant dense<0.000000e+00> : vector<5xf32>
    %157 = vector.multi_reduction <add>, %156, %cst_84 [1] : vector<5x32xf32> to vector<5xf32>
    %158 = vector.shape_cast %157 : vector<5xf32> to vector<5x1xf32>
    %cst_85 = arith.constant 3.200000e+01 : f32
    %159 = vector.broadcast %cst_85 : f32 to vector<5x1xf32>
    %160 = arith.divf %158, %159 : vector<5x1xf32>
    %cst_86 = arith.constant 9.99999974E-6 : f32
    %161 = vector.broadcast %cst_86 : f32 to vector<5x1xf32>
    %162 = arith.addf %160, %161 : vector<5x1xf32>
    %163 = math.rsqrt %162 : vector<5x1xf32>
    %164 = vector.broadcast %163 : vector<5x1xf32> to vector<5x32xf32>
    %165 = arith.mulf %155, %164 : vector<5x32xf32>
    %166 = vector.broadcast %147 : vector<1x32xf32> to vector<5x32xf32>
    %167 = arith.mulf %165, %166 : vector<5x32xf32>
    %168 = vector.broadcast %149 : vector<1x32xf32> to vector<5x32xf32>
    %169 = arith.addf %167, %168 : vector<5x32xf32>
    %c0_87 = arith.constant 0 : index
    %c0_88 = arith.constant 0 : index
    %c0_89 = arith.constant 0 : index
    %170 = vector.load %arg15[%c0_87, %c0_88, %c0_89] : memref<2x32x128xf32, #tpu.memory_space<vmem>>, vector<1x32x128xf32>
    %171 = vector.shape_cast %170 : vector<1x32x128xf32> to vector<32x128xf32>
    %cst_90 = arith.constant dense<0.000000e+00> : vector<5x128xf32>
    %172 = tpu.matmul %169, %171, %cst_90 {dimension_numbers = #tpu.dot_dimension_numbers<[1], [0], [0], [1], [0, 0, 1, 1], [], []>} : vector<5x32xf32>, vector<32x128xf32>, vector<5x128xf32> -> vector<5x128xf32>
    %c0_91 = arith.constant 0 : index
    %c0_92 = arith.constant 0 : index
    %c0_93 = arith.constant 0 : index
    %173 = vector.load %arg16[%c0_91, %c0_92, %c0_93] : memref<2x1x128xf32, #tpu.memory_space<vmem>>, vector<1x1x128xf32>
    %174 = vector.shape_cast %173 : vector<1x1x128xf32> to vector<1x128xf32>
    %175 = vector.broadcast %174 : vector<1x128xf32> to vector<5x128xf32>
    %176 = arith.addf %172, %175 : vector<5x128xf32>
    %cst_94 = arith.constant -1.702000e+00 : f32
    %177 = vector.broadcast %cst_94 : f32 to vector<5x128xf32>
    %178 = arith.mulf %177, %176 : vector<5x128xf32>
    %179 = math.exp %178 : vector<5x128xf32>
    %cst_95 = arith.constant 1.000000e+00 : f32
    %180 = vector.broadcast %cst_95 : f32 to vector<5x128xf32>
    %181 = arith.addf %180, %179 : vector<5x128xf32>
    %cst_96 = arith.constant 1.000000e+00 : f32
    %182 = vector.broadcast %cst_96 : f32 to vector<5x128xf32>
    %183 = arith.divf %182, %181 : vector<5x128xf32>
    %184 = arith.mulf %176, %183 : vector<5x128xf32>
    %c0_97 = arith.constant 0 : index
    %c0_98 = arith.constant 0 : index
    %c0_99 = arith.constant 0 : index
    %185 = vector.load %arg17[%c0_97, %c0_98, %c0_99] : memref<2x128x32xf32, #tpu.memory_space<vmem>>, vector<1x128x32xf32>
    %186 = vector.shape_cast %185 : vector<1x128x32xf32> to vector<128x32xf32>
    %cst_100 = arith.constant dense<0.000000e+00> : vector<5x32xf32>
    %187 = tpu.matmul %184, %186, %cst_100 {dimension_numbers = #tpu.dot_dimension_numbers<[1], [0], [0], [1], [0, 0, 1, 1], [], []>} : vector<5x128xf32>, vector<128x32xf32>, vector<5x32xf32> -> vector<5x32xf32>
    %188 = arith.addf %145, %187 : vector<5x32xf32>
    %c0_101 = arith.constant 0 : index
    %c0_102 = arith.constant 0 : index
    %c0_103 = arith.constant 0 : index
    %189 = vector.load %arg18[%c0_101, %c0_102, %c0_103] : memref<2x1x32xf32, #tpu.memory_space<vmem>>, vector<1x1x32xf32>
    %190 = vector.shape_cast %189 : vector<1x1x32xf32> to vector<1x32xf32>
    %191 = vector.broadcast %190 : vector<1x32xf32> to vector<5x32xf32>
    %192 = arith.addf %188, %191 : vector<5x32xf32>
    %c1_104 = arith.constant 1 : index
    %c0_105 = arith.constant 0 : index
    %c0_106 = arith.constant 0 : index
    %193 = vector.load %arg7[%c1_104, %c0_105, %c0_106] : memref<2x1x32xf32, #tpu.memory_space<vmem>>, vector<1x1x32xf32>
    %194 = vector.shape_cast %193 : vector<1x1x32xf32> to vector<1x32xf32>
    %c1_107 = arith.constant 1 : index
    %c0_108 = arith.constant 0 : index
    %c0_109 = arith.constant 0 : index
    %195 = vector.load %arg8[%c1_107, %c0_108, %c0_109] : memref<2x1x32xf32, #tpu.memory_space<vmem>>, vector<1x1x32xf32>
    %196 = vector.shape_cast %195 : vector<1x1x32xf32> to vector<1x32xf32>
    %cst_110 = arith.constant dense<0.000000e+00> : vector<5xf32>
    %197 = vector.multi_reduction <add>, %192, %cst_110 [1] : vector<5x32xf32> to vector<5xf32>
    %198 = vector.shape_cast %197 : vector<5xf32> to vector<5x1xf32>
    %cst_111 = arith.constant 3.200000e+01 : f32
    %199 = vector.broadcast %cst_111 : f32 to vector<5x1xf32>
    %200 = arith.divf %198, %199 : vector<5x1xf32>
    %201 = vector.broadcast %200 : vector<5x1xf32> to vector<5x32xf32>
    %202 = arith.subf %192, %201 : vector<5x32xf32>
    %203 = arith.mulf %202, %202 : vector<5x32xf32>
    %cst_112 = arith.constant dense<0.000000e+00> : vector<5xf32>
    %204 = vector.multi_reduction <add>, %203, %cst_112 [1] : vector<5x32xf32> to vector<5xf32>
    %205 = vector.shape_cast %204 : vector<5xf32> to vector<5x1xf32>
    %cst_113 = arith.constant 3.200000e+01 : f32
    %206 = vector.broadcast %cst_113 : f32 to vector<5x1xf32>
    %207 = arith.divf %205, %206 : vector<5x1xf32>
    %cst_114 = arith.constant 9.99999974E-6 : f32
    %208 = vector.broadcast %cst_114 : f32 to vector<5x1xf32>
    %209 = arith.addf %207, %208 : vector<5x1xf32>
    %210 = math.rsqrt %209 : vector<5x1xf32>
    %211 = vector.broadcast %210 : vector<5x1xf32> to vector<5x32xf32>
    %212 = arith.mulf %202, %211 : vector<5x32xf32>
    %213 = vector.broadcast %194 : vector<1x32xf32> to vector<5x32xf32>
    %214 = arith.mulf %212, %213 : vector<5x32xf32>
    %215 = vector.broadcast %196 : vector<1x32xf32> to vector<5x32xf32>
    %216 = arith.addf %214, %215 : vector<5x32xf32>
    %c1_115 = arith.constant 1 : index
    %c0_116 = arith.constant 0 : index
    %c0_117 = arith.constant 0 : index
    %217 = vector.load %arg9[%c1_115, %c0_116, %c0_117] : memref<2x32x96xf32, #tpu.memory_space<vmem>>, vector<1x32x96xf32>
    %218 = vector.shape_cast %217 : vector<1x32x96xf32> to vector<32x96xf32>
    %cst_118 = arith.constant dense<0.000000e+00> : vector<5x96xf32>
    %219 = tpu.matmul %216, %218, %cst_118 {dimension_numbers = #tpu.dot_dimension_numbers<[1], [0], [0], [1], [0, 0, 1, 1], [], []>} : vector<5x32xf32>, vector<32x96xf32>, vector<5x96xf32> -> vector<5x96xf32>
    %c1_119 = arith.constant 1 : index
    %c0_120 = arith.constant 0 : index
    %c0_121 = arith.constant 0 : index
    %220 = vector.load %arg10[%c1_119, %c0_120, %c0_121] : memref<2x1x96xf32, #tpu.memory_space<vmem>>, vector<1x1x96xf32>
    %221 = vector.shape_cast %220 : vector<1x1x96xf32> to vector<1x96xf32>
    %222 = vector.broadcast %221 : vector<1x96xf32> to vector<5x96xf32>
    %223 = arith.addf %219, %222 : vector<5x96xf32>
    %224 = vector.extract_strided_slice %223 {offsets = [0, 0], sizes = [5, 8], strides = [1, 1]} : vector<5x96xf32> to vector<5x8xf32>
    %225 = vector.extract_strided_slice %223 {offsets = [0, 32], sizes = [5, 8], strides = [1, 1]} : vector<5x96xf32> to vector<5x8xf32>
    %226 = vector.extract_strided_slice %223 {offsets = [0, 64], sizes = [5, 8], strides = [1, 1]} : vector<5x96xf32> to vector<5x8xf32>
    %cst_122 = arith.constant dense<0.000000e+00> : vector<5x5xf32>
    %227 = tpu.matmul %224, %225, %cst_122 {dimension_numbers = #tpu.dot_dimension_numbers<[1], [1], [0], [0], [0, 0, 1, 0], [], []>} : vector<5x8xf32>, vector<5x8xf32>, vector<5x5xf32> -> vector<5x5xf32>
    %cst_123 = arith.constant 0.353553385 : f32
    %228 = vector.broadcast %cst_123 : f32 to vector<5x5xf32>
    %229 = arith.mulf %227, %228 : vector<5x5xf32>
    %cst_124 = arith.constant dense<0xFF800000> : vector<5xf32>
    %230 = vector.multi_reduction <maximumf>, %229, %cst_124 [1] : vector<5x5xf32> to vector<5xf32>
    %231 = vector.shape_cast %230 : vector<5xf32> to vector<5x1xf32>
    %232 = vector.broadcast %231 : vector<5x1xf32> to vector<5x5xf32>
    %233 = arith.subf %229, %232 : vector<5x5xf32>
    %234 = math.exp %233 : vector<5x5xf32>
    %cst_125 = arith.constant dense<0.000000e+00> : vector<5xf32>
    %235 = vector.multi_reduction <add>, %234, %cst_125 [1] : vector<5x5xf32> to vector<5xf32>
    %236 = vector.shape_cast %235 : vector<5xf32> to vector<5x1xf32>
    %237 = tpu.reciprocal %236 {approx = true} : vector<5x1xf32> -> vector<5x1xf32>
    %238 = vector.broadcast %237 : vector<5x1xf32> to vector<5x5xf32>
    %239 = arith.mulf %234, %238 : vector<5x5xf32>
    %cst_126 = arith.constant dense<0.000000e+00> : vector<5x8xf32>
    %240 = tpu.matmul %239, %226, %cst_126 {dimension_numbers = #tpu.dot_dimension_numbers<[1], [0], [0], [1], [0, 0, 1, 1], [], []>} : vector<5x5xf32>, vector<5x8xf32>, vector<5x8xf32> -> vector<5x8xf32>
    %c0_127 = arith.constant 0 : index
    %c0_128 = arith.constant 0 : index
    %241 = vector.load %arg28[%c0_127, %c0_128] : memref<5x32xf32, #tpu.memory_space<vmem>>, vector<5x8xf32>
    tpu.vector_store %arg28[%c0_127, %c0_128], %240 {strides = array<i32>} : memref<5x32xf32, #tpu.memory_space<vmem>>, vector<5x8xf32>,
    %242 = vector.extract_strided_slice %223 {offsets = [0, 8], sizes = [5, 8], strides = [1, 1]} : vector<5x96xf32> to vector<5x8xf32>
    %243 = vector.extract_strided_slice %223 {offsets = [0, 40], sizes = [5, 8], strides = [1, 1]} : vector<5x96xf32> to vector<5x8xf32>
    %244 = vector.extract_strided_slice %223 {offsets = [0, 72], sizes = [5, 8], strides = [1, 1]} : vector<5x96xf32> to vector<5x8xf32>
    %cst_129 = arith.constant dense<0.000000e+00> : vector<5x5xf32>
    %245 = tpu.matmul %242, %243, %cst_129 {dimension_numbers = #tpu.dot_dimension_numbers<[1], [1], [0], [0], [0, 0, 1, 0], [], []>} : vector<5x8xf32>, vector<5x8xf32>, vector<5x5xf32> -> vector<5x5xf32>
    %cst_130 = arith.constant 0.353553385 : f32
    %246 = vector.broadcast %cst_130 : f32 to vector<5x5xf32>
    %247 = arith.mulf %245, %246 : vector<5x5xf32>
    %cst_131 = arith.constant dense<0xFF800000> : vector<5xf32>
    %248 = vector.multi_reduction <maximumf>, %247, %cst_131 [1] : vector<5x5xf32> to vector<5xf32>
    %249 = vector.shape_cast %248 : vector<5xf32> to vector<5x1xf32>
    %250 = vector.broadcast %249 : vector<5x1xf32> to vector<5x5xf32>
    %251 = arith.subf %247, %250 : vector<5x5xf32>
    %252 = math.exp %251 : vector<5x5xf32>
    %cst_132 = arith.constant dense<0.000000e+00> : vector<5xf32>
    %253 = vector.multi_reduction <add>, %252, %cst_132 [1] : vector<5x5xf32> to vector<5xf32>
    %254 = vector.shape_cast %253 : vector<5xf32> to vector<5x1xf32>
    %255 = tpu.reciprocal %254 {approx = true} : vector<5x1xf32> -> vector<5x1xf32>
    %256 = vector.broadcast %255 : vector<5x1xf32> to vector<5x5xf32>
    %257 = arith.mulf %252, %256 : vector<5x5xf32>
    %cst_133 = arith.constant dense<0.000000e+00> : vector<5x8xf32>
    %258 = tpu.matmul %257, %244, %cst_133 {dimension_numbers = #tpu.dot_dimension_numbers<[1], [0], [0], [1], [0, 0, 1, 1], [], []>} : vector<5x5xf32>, vector<5x8xf32>, vector<5x8xf32> -> vector<5x8xf32>
    %c0_134 = arith.constant 0 : index
    %c8_135 = arith.constant 8 : index
    %259 = vector.load %arg28[%c0_134, %c8_135] : memref<5x32xf32, #tpu.memory_space<vmem>>, vector<5x8xf32>
    tpu.vector_store %arg28[%c0_134, %c8_135], %258 {strides = array<i32>} : memref<5x32xf32, #tpu.memory_space<vmem>>, vector<5x8xf32>,
    %260 = vector.extract_strided_slice %223 {offsets = [0, 16], sizes = [5, 8], strides = [1, 1]} : vector<5x96xf32> to vector<5x8xf32>
    %261 = vector.extract_strided_slice %223 {offsets = [0, 48], sizes = [5, 8], strides = [1, 1]} : vector<5x96xf32> to vector<5x8xf32>
    %262 = vector.extract_strided_slice %223 {offsets = [0, 80], sizes = [5, 8], strides = [1, 1]} : vector<5x96xf32> to vector<5x8xf32>
    %cst_136 = arith.constant dense<0.000000e+00> : vector<5x5xf32>
    %263 = tpu.matmul %260, %261, %cst_136 {dimension_numbers = #tpu.dot_dimension_numbers<[1], [1], [0], [0], [0, 0, 1, 0], [], []>} : vector<5x8xf32>, vector<5x8xf32>, vector<5x5xf32> -> vector<5x5xf32>
    %cst_137 = arith.constant 0.353553385 : f32
    %264 = vector.broadcast %cst_137 : f32 to vector<5x5xf32>
    %265 = arith.mulf %263, %264 : vector<5x5xf32>
    %cst_138 = arith.constant dense<0xFF800000> : vector<5xf32>
    %266 = vector.multi_reduction <maximumf>, %265, %cst_138 [1] : vector<5x5xf32> to vector<5xf32>
    %267 = vector.shape_cast %266 : vector<5xf32> to vector<5x1xf32>
    %268 = vector.broadcast %267 : vector<5x1xf32> to vector<5x5xf32>
    %269 = arith.subf %265, %268 : vector<5x5xf32>
    %270 = math.exp %269 : vector<5x5xf32>
    %cst_139 = arith.constant dense<0.000000e+00> : vector<5xf32>
    %271 = vector.multi_reduction <add>, %270, %cst_139 [1] : vector<5x5xf32> to vector<5xf32>
    %272 = vector.shape_cast %271 : vector<5xf32> to vector<5x1xf32>
    %273 = tpu.reciprocal %272 {approx = true} : vector<5x1xf32> -> vector<5x1xf32>
    %274 = vector.broadcast %273 : vector<5x1xf32> to vector<5x5xf32>
    %275 = arith.mulf %270, %274 : vector<5x5xf32>
    %cst_140 = arith.constant dense<0.000000e+00> : vector<5x8xf32>
    %276 = tpu.matmul %275, %262, %cst_140 {dimension_numbers = #tpu.dot_dimension_numbers<[1], [0], [0], [1], [0, 0, 1, 1], [], []>} : vector<5x5xf32>, vector<5x8xf32>, vector<5x8xf32> -> vector<5x8xf32>
    %c0_141 = arith.constant 0 : index
    %c16_142 = arith.constant 16 : index
    %277 = vector.load %arg28[%c0_141, %c16_142] : memref<5x32xf32, #tpu.memory_space<vmem>>, vector<5x8xf32>
    tpu.vector_store %arg28[%c0_141, %c16_142], %276 {strides = array<i32>} : memref<5x32xf32, #tpu.memory_space<vmem>>, vector<5x8xf32>,
    %278 = vector.extract_strided_slice %223 {offsets = [0, 24], sizes = [5, 8], strides = [1, 1]} : vector<5x96xf32> to vector<5x8xf32>
    %279 = vector.extract_strided_slice %223 {offsets = [0, 56], sizes = [5, 8], strides = [1, 1]} : vector<5x96xf32> to vector<5x8xf32>
    %280 = vector.extract_strided_slice %223 {offsets = [0, 88], sizes = [5, 8], strides = [1, 1]} : vector<5x96xf32> to vector<5x8xf32>
    %cst_143 = arith.constant dense<0.000000e+00> : vector<5x5xf32>
    %281 = tpu.matmul %278, %279, %cst_143 {dimension_numbers = #tpu.dot_dimension_numbers<[1], [1], [0], [0], [0, 0, 1, 0], [], []>} : vector<5x8xf32>, vector<5x8xf32>, vector<5x5xf32> -> vector<5x5xf32>
    %cst_144 = arith.constant 0.353553385 : f32
    %282 = vector.broadcast %cst_144 : f32 to vector<5x5xf32>
    %283 = arith.mulf %281, %282 : vector<5x5xf32>
    %cst_145 = arith.constant dense<0xFF800000> : vector<5xf32>
    %284 = vector.multi_reduction <maximumf>, %283, %cst_145 [1] : vector<5x5xf32> to vector<5xf32>
    %285 = vector.shape_cast %284 : vector<5xf32> to vector<5x1xf32>
    %286 = vector.broadcast %285 : vector<5x1xf32> to vector<5x5xf32>
    %287 = arith.subf %283, %286 : vector<5x5xf32>
    %288 = math.exp %287 : vector<5x5xf32>
    %cst_146 = arith.constant dense<0.000000e+00> : vector<5xf32>
    %289 = vector.multi_reduction <add>, %288, %cst_146 [1] : vector<5x5xf32> to vector<5xf32>
    %290 = vector.shape_cast %289 : vector<5xf32> to vector<5x1xf32>
    %291 = tpu.reciprocal %290 {approx = true} : vector<5x1xf32> -> vector<5x1xf32>
    %292 = vector.broadcast %291 : vector<5x1xf32> to vector<5x5xf32>
    %293 = arith.mulf %288, %292 : vector<5x5xf32>
    %cst_147 = arith.constant dense<0.000000e+00> : vector<5x8xf32>
    %294 = tpu.matmul %293, %280, %cst_147 {dimension_numbers = #tpu.dot_dimension_numbers<[1], [0], [0], [1], [0, 0, 1, 1], [], []>} : vector<5x5xf32>, vector<5x8xf32>, vector<5x8xf32> -> vector<5x8xf32>
    %c0_148 = arith.constant 0 : index
    %c24_149 = arith.constant 24 : index
    %295 = vector.load %arg28[%c0_148, %c24_149] : memref<5x32xf32, #tpu.memory_space<vmem>>, vector<5x8xf32>
    tpu.vector_store %arg28[%c0_148, %c24_149], %294 {strides = array<i32>} : memref<5x32xf32, #tpu.memory_space<vmem>>, vector<5x8xf32>,
    %c0_150 = arith.constant 0 : index
    %c0_151 = arith.constant 0 : index
    %296 = vector.load %arg28[%c0_150, %c0_151] : memref<5x32xf32, #tpu.memory_space<vmem>>, vector<5x32xf32>
    %c1_152 = arith.constant 1 : index
    %c0_153 = arith.constant 0 : index
    %c0_154 = arith.constant 0 : index
    %297 = vector.load %arg11[%c1_152, %c0_153, %c0_154] : memref<2x32x32xf32, #tpu.memory_space<vmem>>, vector<1x32x32xf32>
    %298 = vector.shape_cast %297 : vector<1x32x32xf32> to vector<32x32xf32>
    %cst_155 = arith.constant dense<0.000000e+00> : vector<5x32xf32>
    %299 = tpu.matmul %296, %298, %cst_155 {dimension_numbers = #tpu.dot_dimension_numbers<[1], [0], [0], [1], [0, 0, 1, 1], [], []>} : vector<5x32xf32>, vector<32x32xf32>, vector<5x32xf32> -> vector<5x32xf32>
    %c1_156 = arith.constant 1 : index
    %c0_157 = arith.constant 0 : index
    %c0_158 = arith.constant 0 : index
    %300 = vector.load %arg12[%c1_156, %c0_157, %c0_158] : memref<2x1x32xf32, #tpu.memory_space<vmem>>, vector<1x1x32xf32>
    %301 = vector.shape_cast %300 : vector<1x1x32xf32> to vector<1x32xf32>
    %302 = vector.broadcast %301 : vector<1x32xf32> to vector<5x32xf32>
    %303 = arith.addf %299, %302 : vector<5x32xf32>
    %304 = arith.addf %192, %303 : vector<5x32xf32>
    %c1_159 = arith.constant 1 : index
    %c0_160 = arith.constant 0 : index
    %c0_161 = arith.constant 0 : index
    %305 = vector.load %arg13[%c1_159, %c0_160, %c0_161] : memref<2x1x32xf32, #tpu.memory_space<vmem>>, vector<1x1x32xf32>
    %306 = vector.shape_cast %305 : vector<1x1x32xf32> to vector<1x32xf32>
    %c1_162 = arith.constant 1 : index
    %c0_163 = arith.constant 0 : index
    %c0_164 = arith.constant 0 : index
    %307 = vector.load %arg14[%c1_162, %c0_163, %c0_164] : memref<2x1x32xf32, #tpu.memory_space<vmem>>, vector<1x1x32xf32>
    %308 = vector.shape_cast %307 : vector<1x1x32xf32> to vector<1x32xf32>
    %cst_165 = arith.constant dense<0.000000e+00> : vector<5xf32>
    %309 = vector.multi_reduction <add>, %304, %cst_165 [1] : vector<5x32xf32> to vector<5xf32>
    %310 = vector.shape_cast %309 : vector<5xf32> to vector<5x1xf32>
    %cst_166 = arith.constant 3.200000e+01 : f32
    %311 = vector.broadcast %cst_166 : f32 to vector<5x1xf32>
    %312 = arith.divf %310, %311 : vector<5x1xf32>
    %313 = vector.broadcast %312 : vector<5x1xf32> to vector<5x32xf32>
    %314 = arith.subf %304, %313 : vector<5x32xf32>
    %315 = arith.mulf %314, %314 : vector<5x32xf32>
    %cst_167 = arith.constant dense<0.000000e+00> : vector<5xf32>
    %316 = vector.multi_reduction <add>, %315, %cst_167 [1] : vector<5x32xf32> to vector<5xf32>
    %317 = vector.shape_cast %316 : vector<5xf32> to vector<5x1xf32>
    %cst_168 = arith.constant 3.200000e+01 : f32
    %318 = vector.broadcast %cst_168 : f32 to vector<5x1xf32>
    %319 = arith.divf %317, %318 : vector<5x1xf32>
    %cst_169 = arith.constant 9.99999974E-6 : f32
    %320 = vector.broadcast %cst_169 : f32 to vector<5x1xf32>
    %321 = arith.addf %319, %320 : vector<5x1xf32>
    %322 = math.rsqrt %321 : vector<5x1xf32>
    %323 = vector.broadcast %322 : vector<5x1xf32> to vector<5x32xf32>
    %324 = arith.mulf %314, %323 : vector<5x32xf32>
    %325 = vector.broadcast %306 : vector<1x32xf32> to vector<5x32xf32>
    %326 = arith.mulf %324, %325 : vector<5x32xf32>
    %327 = vector.broadcast %308 : vector<1x32xf32> to vector<5x32xf32>
    %328 = arith.addf %326, %327 : vector<5x32xf32>
    %c1_170 = arith.constant 1 : index
    %c0_171 = arith.constant 0 : index
    %c0_172 = arith.constant 0 : index
    %329 = vector.load %arg15[%c1_170, %c0_171, %c0_172] : memref<2x32x128xf32, #tpu.memory_space<vmem>>, vector<1x32x128xf32>
    %330 = vector.shape_cast %329 : vector<1x32x128xf32> to vector<32x128xf32>
    %cst_173 = arith.constant dense<0.000000e+00> : vector<5x128xf32>
    %331 = tpu.matmul %328, %330, %cst_173 {dimension_numbers = #tpu.dot_dimension_numbers<[1], [0], [0], [1], [0, 0, 1, 1], [], []>} : vector<5x32xf32>, vector<32x128xf32>, vector<5x128xf32> -> vector<5x128xf32>
    %c1_174 = arith.constant 1 : index
    %c0_175 = arith.constant 0 : index
    %c0_176 = arith.constant 0 : index
    %332 = vector.load %arg16[%c1_174, %c0_175, %c0_176] : memref<2x1x128xf32, #tpu.memory_space<vmem>>, vector<1x1x128xf32>
    %333 = vector.shape_cast %332 : vector<1x1x128xf32> to vector<1x128xf32>
    %334 = vector.broadcast %333 : vector<1x128xf32> to vector<5x128xf32>
    %335 = arith.addf %331, %334 : vector<5x128xf32>
    %cst_177 = arith.constant -1.702000e+00 : f32
    %336 = vector.broadcast %cst_177 : f32 to vector<5x128xf32>
    %337 = arith.mulf %336, %335 : vector<5x128xf32>
    %338 = math.exp %337 : vector<5x128xf32>
    %cst_178 = arith.constant 1.000000e+00 : f32
    %339 = vector.broadcast %cst_178 : f32 to vector<5x128xf32>
    %340 = arith.addf %339, %338 : vector<5x128xf32>
    %cst_179 = arith.constant 1.000000e+00 : f32
    %341 = vector.broadcast %cst_179 : f32 to vector<5x128xf32>
    %342 = arith.divf %341, %340 : vector<5x128xf32>
    %343 = arith.mulf %335, %342 : vector<5x128xf32>
    %c1_180 = arith.constant 1 : index
    %c0_181 = arith.constant 0 : index
    %c0_182 = arith.constant 0 : index
    %344 = vector.load %arg17[%c1_180, %c0_181, %c0_182] : memref<2x128x32xf32, #tpu.memory_space<vmem>>, vector<1x128x32xf32>
    %345 = vector.shape_cast %344 : vector<1x128x32xf32> to vector<128x32xf32>
    %cst_183 = arith.constant dense<0.000000e+00> : vector<5x32xf32>
    %346 = tpu.matmul %343, %345, %cst_183 {dimension_numbers = #tpu.dot_dimension_numbers<[1], [0], [0], [1], [0, 0, 1, 1], [], []>} : vector<5x128xf32>, vector<128x32xf32>, vector<5x32xf32> -> vector<5x32xf32>
    %347 = arith.addf %304, %346 : vector<5x32xf32>
    %c1_184 = arith.constant 1 : index
    %c0_185 = arith.constant 0 : index
    %c0_186 = arith.constant 0 : index
    %348 = vector.load %arg18[%c1_184, %c0_185, %c0_186] : memref<2x1x32xf32, #tpu.memory_space<vmem>>, vector<1x1x32xf32>
    %349 = vector.shape_cast %348 : vector<1x1x32xf32> to vector<1x32xf32>
    %350 = vector.broadcast %349 : vector<1x32xf32> to vector<5x32xf32>
    %351 = arith.addf %347, %350 : vector<5x32xf32>
    %352 = vector.extract_strided_slice %351 {offsets = [0, 0], sizes = [1, 32], strides = [1, 1]} : vector<5x32xf32> to vector<1x32xf32>
    %c0_187 = arith.constant 0 : index
    %c0_188 = arith.constant 0 : index
    %353 = vector.load %arg19[%c0_187, %c0_188] : memref<1x32xf32, #tpu.memory_space<vmem>>, vector<1x32xf32>
    %c0_189 = arith.constant 0 : index
    %c0_190 = arith.constant 0 : index
    %354 = vector.load %arg20[%c0_189, %c0_190] : memref<1x32xf32, #tpu.memory_space<vmem>>, vector<1x32xf32>
    %cst_191 = arith.constant dense<0.000000e+00> : vector<1xf32>
    %355 = vector.multi_reduction <add>, %352, %cst_191 [1] : vector<1x32xf32> to vector<1xf32>
    %356 = vector.shape_cast %355 : vector<1xf32> to vector<1x1xf32>
    %cst_192 = arith.constant 3.200000e+01 : f32
    %357 = vector.broadcast %cst_192 : f32 to vector<1x1xf32>
    %358 = arith.divf %356, %357 : vector<1x1xf32>
    %359 = vector.broadcast %358 : vector<1x1xf32> to vector<1x32xf32>
    %360 = arith.subf %352, %359 : vector<1x32xf32>
    %361 = arith.mulf %360, %360 : vector<1x32xf32>
    %cst_193 = arith.constant dense<0.000000e+00> : vector<1xf32>
    %362 = vector.multi_reduction <add>, %361, %cst_193 [1] : vector<1x32xf32> to vector<1xf32>
    %363 = vector.shape_cast %362 : vector<1xf32> to vector<1x1xf32>
    %cst_194 = arith.constant 3.200000e+01 : f32
    %364 = vector.broadcast %cst_194 : f32 to vector<1x1xf32>
    %365 = arith.divf %363, %364 : vector<1x1xf32>
    %cst_195 = arith.constant 9.99999974E-6 : f32
    %366 = vector.broadcast %cst_195 : f32 to vector<1x1xf32>
    %367 = arith.addf %365, %366 : vector<1x1xf32>
    %368 = math.rsqrt %367 : vector<1x1xf32>
    %369 = vector.broadcast %368 : vector<1x1xf32> to vector<1x32xf32>
    %370 = arith.mulf %360, %369 : vector<1x32xf32>
    %371 = arith.mulf %370, %353 : vector<1x32xf32>
    %372 = arith.addf %371, %354 : vector<1x32xf32>
    %c0_196 = arith.constant 0 : index
    %c0_197 = arith.constant 0 : index
    %373 = vector.load %arg21[%c0_196, %c0_197] : memref<32x16xf32, #tpu.memory_space<vmem>>, vector<32x16xf32>
    %cst_198 = arith.constant dense<0.000000e+00> : vector<1x16xf32>
    %374 = tpu.matmul %372, %373, %cst_198 {dimension_numbers = #tpu.dot_dimension_numbers<[1], [0], [0], [1], [0, 0, 1, 1], [], []>} : vector<1x32xf32>, vector<32x16xf32>, vector<1x16xf32> -> vector<1x16xf32>
    %c0_199 = arith.constant 0 : index
    %c0_200 = arith.constant 0 : index
    %375 = vector.load %arg22[%c0_199, %c0_200] : memref<1x32xf32, #tpu.memory_space<vmem>>, vector<1x32xf32>
    %376 = arith.mulf %372, %375 : vector<1x32xf32>
    %c0_201 = arith.constant 0 : index
    %c0_202 = arith.constant 0 : index
    %377 = vector.load %arg23[%c0_201, %c0_202] : memref<1x32xf32, #tpu.memory_space<vmem>>, vector<1x32xf32>
    %378 = arith.addf %376, %377 : vector<1x32xf32>
    %c0_203 = arith.constant 0 : index
    %c0_204 = arith.constant 0 : index
    %379 = vector.load %arg24[%c0_203, %c0_204] : memref<1x16xf32, #tpu.memory_space<vmem>>, vector<1x16xf32>
    %380 = arith.mulf %374, %379 : vector<1x16xf32>
    %c0_205 = arith.constant 0 : index
    %c0_206 = arith.constant 0 : index
    %381 = vector.load %arg25[%c0_205, %c0_206] : memref<1x16xf32, #tpu.memory_space<vmem>>, vector<1x16xf32>
    %382 = arith.addf %380, %381 : vector<1x16xf32>
    %c0_207 = arith.constant 0 : index
    %c0_208 = arith.constant 0 : index
    %c0_209 = arith.constant 0 : index
    %383 = vector.load %arg26[%c0_207, %c0_208, %c0_209] : memref<1x1x128xf32, #tpu.memory_space<vmem>>, vector<1x1x32xf32>
    %384 = vector.shape_cast %383 : vector<1x1x32xf32> to vector<1x32xf32>
    %385 = vector.shape_cast %378 : vector<1x32xf32> to vector<1x1x32xf32>
    tpu.vector_store %arg26[%c0_207, %c0_208, %c0_209], %385 {strides = array<i32>} : memref<1x1x128xf32, #tpu.memory_space<vmem>>, vector<1x1x32xf32>,
    %c0_210 = arith.constant 0 : index
    %c0_211 = arith.constant 0 : index
    %c32 = arith.constant 32 : index
    %386 = vector.load %arg26[%c0_210, %c0_211, %c32] : memref<1x1x128xf32, #tpu.memory_space<vmem>>, vector<1x1x16xf32>
    %387 = vector.shape_cast %386 : vector<1x1x16xf32> to vector<1x16xf32>
    %388 = vector.shape_cast %382 : vector<1x16xf32> to vector<1x1x16xf32>
    tpu.vector_store %arg26[%c0_210, %c0_211, %c32], %388 {strides = array<i32>} : memref<1x1x128xf32, #tpu.memory_space<vmem>>, vector<1x1x16xf32>,
    %cst_212 = arith.constant 0.000000e+00 : f32
    %389 = vector.broadcast %cst_212 : f32 to vector<1x80xf32>
    %c0_213 = arith.constant 0 : index
    %c0_214 = arith.constant 0 : index
    %c48 = arith.constant 48 : index
    %390 = vector.load %arg26[%c0_213, %c0_214, %c48] : memref<1x1x128xf32, #tpu.memory_space<vmem>>, vector<1x1x80xf32>
    %391 = vector.shape_cast %390 : vector<1x1x80xf32> to vector<1x80xf32>
    %392 = vector.shape_cast %389 : vector<1x80xf32> to vector<1x1x80xf32>
    tpu.vector_store %arg26[%c0_213, %c0_214, %c48], %392 {strides = array<i32>} : memref<1x1x128xf32, #tpu.memory_space<vmem>>, vector<1x1x80xf32>,
    return
  }
  func.func @transform_0(%arg0: i32) -> (i32, i32, i32) {
    %c0_i32 = arith.constant 0 : i32
    %c0_i32_0 = arith.constant 0 : i32
    %c0_i32_1 = arith.constant 0 : i32
    return %arg0, %c0_i32, %c0_i32_0 : i32, i32, i32
  }
  func.func @transform_1(%arg0: i32) -> (i32, i32) {
    %c0_i32 = arith.constant 0 : i32
    %c0_i32_0 = arith.constant 0 : i32
    %c0_i32_1 = arith.constant 0 : i32
    return %c0_i32, %c0_i32_0 : i32, i32
  }
  func.func @transform_2(%arg0: i32) -> (i32, i32) {
    %c0_i32 = arith.constant 0 : i32
    %c0_i32_0 = arith.constant 0 : i32
    %c0_i32_1 = arith.constant 0 : i32
    return %c0_i32, %c0_i32_0 : i32, i32
  }
  func.func @transform_3(%arg0: i32) -> (i32, i32) {
    %c0_i32 = arith.constant 0 : i32
    %c0_i32_0 = arith.constant 0 : i32
    %c0_i32_1 = arith.constant 0 : i32
    return %c0_i32, %c0_i32_0 : i32, i32
  }
  func.func @transform_4(%arg0: i32) -> (i32, i32) {
    %c0_i32 = arith.constant 0 : i32
    %c0_i32_0 = arith.constant 0 : i32
    %c0_i32_1 = arith.constant 0 : i32
    return %c0_i32, %c0_i32_0 : i32, i32
  }
  func.func @transform_5(%arg0: i32) -> (i32, i32) {
    %c0_i32 = arith.constant 0 : i32
    %c0_i32_0 = arith.constant 0 : i32
    %c0_i32_1 = arith.constant 0 : i32
    return %c0_i32, %c0_i32_0 : i32, i32
  }
  func.func @transform_6(%arg0: i32) -> (i32, i32, i32) {
    %c0_i32 = arith.constant 0 : i32
    %c0_i32_0 = arith.constant 0 : i32
    %c0_i32_1 = arith.constant 0 : i32
    %c0_i32_2 = arith.constant 0 : i32
    return %c0_i32, %c0_i32_0, %c0_i32_1 : i32, i32, i32
  }
  func.func @transform_7(%arg0: i32) -> (i32, i32, i32) {
    %c0_i32 = arith.constant 0 : i32
    %c0_i32_0 = arith.constant 0 : i32
    %c0_i32_1 = arith.constant 0 : i32
    %c0_i32_2 = arith.constant 0 : i32
    return %c0_i32, %c0_i32_0, %c0_i32_1 : i32, i32, i32
  }
  func.func @transform_8(%arg0: i32) -> (i32, i32, i32) {
    %c0_i32 = arith.constant 0 : i32
    %c0_i32_0 = arith.constant 0 : i32
    %c0_i32_1 = arith.constant 0 : i32
    %c0_i32_2 = arith.constant 0 : i32
    return %c0_i32, %c0_i32_0, %c0_i32_1 : i32, i32, i32
  }
  func.func @transform_9(%arg0: i32) -> (i32, i32, i32) {
    %c0_i32 = arith.constant 0 : i32
    %c0_i32_0 = arith.constant 0 : i32
    %c0_i32_1 = arith.constant 0 : i32
    %c0_i32_2 = arith.constant 0 : i32
    return %c0_i32, %c0_i32_0, %c0_i32_1 : i32, i32, i32
  }
  func.func @transform_10(%arg0: i32) -> (i32, i32, i32) {
    %c0_i32 = arith.constant 0 : i32
    %c0_i32_0 = arith.constant 0 : i32
    %c0_i32_1 = arith.constant 0 : i32
    %c0_i32_2 = arith.constant 0 : i32
    return %c0_i32, %c0_i32_0, %c0_i32_1 : i32, i32, i32
  }
  func.func @transform_11(%arg0: i32) -> (i32, i32, i32) {
    %c0_i32 = arith.constant 0 : i32
    %c0_i32_0 = arith.constant 0 : i32
    %c0_i32_1 = arith.constant 0 : i32
    %c0_i32_2 = arith.constant 0 : i32
    return %c0_i32, %c0_i32_0, %c0_i32_1 : i32, i32, i32
  }
  func.func @transform_12(%arg0: i32) -> (i32, i32, i32) {
    %c0_i32 = arith.constant 0 : i32
    %c0_i32_0 = arith.constant 0 : i32
    %c0_i32_1 = arith.constant 0 : i32
    %c0_i32_2 = arith.constant 0 : i32
    return %c0_i32, %c0_i32_0, %c0_i32_1 : i32, i32, i32
  }
  func.func @transform_13(%arg0: i32) -> (i32, i32, i32) {
    %c0_i32 = arith.constant 0 : i32
    %c0_i32_0 = arith.constant 0 : i32
    %c0_i32_1 = arith.constant 0 : i32
    %c0_i32_2 = arith.constant 0 : i32
    return %c0_i32, %c0_i32_0, %c0_i32_1 : i32, i32, i32
  }
  func.func @transform_14(%arg0: i32) -> (i32, i32, i32) {
    %c0_i32 = arith.constant 0 : i32
    %c0_i32_0 = arith.constant 0 : i32
    %c0_i32_1 = arith.constant 0 : i32
    %c0_i32_2 = arith.constant 0 : i32
    return %c0_i32, %c0_i32_0, %c0_i32_1 : i32, i32, i32
  }
  func.func @transform_15(%arg0: i32) -> (i32, i32, i32) {
    %c0_i32 = arith.constant 0 : i32
    %c0_i32_0 = arith.constant 0 : i32
    %c0_i32_1 = arith.constant 0 : i32
    %c0_i32_2 = arith.constant 0 : i32
    return %c0_i32, %c0_i32_0, %c0_i32_1 : i32, i32, i32
  }
  func.func @transform_16(%arg0: i32) -> (i32, i32, i32) {
    %c0_i32 = arith.constant 0 : i32
    %c0_i32_0 = arith.constant 0 : i32
    %c0_i32_1 = arith.constant 0 : i32
    %c0_i32_2 = arith.constant 0 : i32
    return %c0_i32, %c0_i32_0, %c0_i32_1 : i32, i32, i32
  }
  func.func @transform_17(%arg0: i32) -> (i32, i32, i32) {
    %c0_i32 = arith.constant 0 : i32
    %c0_i32_0 = arith.constant 0 : i32
    %c0_i32_1 = arith.constant 0 : i32
    %c0_i32_2 = arith.constant 0 : i32
    return %c0_i32, %c0_i32_0, %c0_i32_1 : i32, i32, i32
  }
  func.func @transform_18(%arg0: i32) -> (i32, i32) {
    %c0_i32 = arith.constant 0 : i32
    %c0_i32_0 = arith.constant 0 : i32
    %c0_i32_1 = arith.constant 0 : i32
    return %c0_i32, %c0_i32_0 : i32, i32
  }
  func.func @transform_19(%arg0: i32) -> (i32, i32) {
    %c0_i32 = arith.constant 0 : i32
    %c0_i32_0 = arith.constant 0 : i32
    %c0_i32_1 = arith.constant 0 : i32
    return %c0_i32, %c0_i32_0 : i32, i32
  }
  func.func @transform_20(%arg0: i32) -> (i32, i32) {
    %c0_i32 = arith.constant 0 : i32
    %c0_i32_0 = arith.constant 0 : i32
    %c0_i32_1 = arith.constant 0 : i32
    return %c0_i32, %c0_i32_0 : i32, i32
  }
  func.func @transform_21(%arg0: i32) -> (i32, i32) {
    %c0_i32 = arith.constant 0 : i32
    %c0_i32_0 = arith.constant 0 : i32
    %c0_i32_1 = arith.constant 0 : i32
    return %c0_i32, %c0_i32_0 : i32, i32
  }
  func.func @transform_22(%arg0: i32) -> (i32, i32) {
    %c0_i32 = arith.constant 0 : i32
    %c0_i32_0 = arith.constant 0 : i32
    %c0_i32_1 = arith.constant 0 : i32
    return %c0_i32, %c0_i32_0 : i32, i32
  }
  func.func @transform_23(%arg0: i32) -> (i32, i32) {
    %c0_i32 = arith.constant 0 : i32
    %c0_i32_0 = arith.constant 0 : i32
    %c0_i32_1 = arith.constant 0 : i32
    return %c0_i32, %c0_i32_0 : i32, i32
  }
  func.func @transform_24(%arg0: i32) -> (i32, i32) {
    %c0_i32 = arith.constant 0 : i32
    %c0_i32_0 = arith.constant 0 : i32
    %c0_i32_1 = arith.constant 0 : i32
    return %c0_i32, %c0_i32_0 : i32, i32
  }
  func.func @transform_25(%arg0: i32) -> (i32, i32, i32) {
    %c0_i32 = arith.constant 0 : i32
    %c0_i32_0 = arith.constant 0 : i32
    %c0_i32_1 = arith.constant 0 : i32
    return %arg0, %c0_i32, %c0_i32_0 : i32, i32, i32
  }
}

</mosaic_0001>

<bundles_post_ra>
// kernel: clip_reid_image_only_forward.1
= control target key start
LH: loop header
LB: loop body
LE: loop exit
PB: predicated region body
PF: predicated region fallthrough
CT: control target
= control target key end

     0   :  { %s3450_s0 = inlined_call_operand.vmem [shape: f32[2,4,768], index: 0, kind: input, shape index: {}]   ;;  %s3451_s1 = inlined_call_operand.vmem [shape: f32[768,32], index: 1, kind: input, shape index: {}]   ;;  %s3452_s2 = inlined_call_operand.vmem [shape: f32[1,32], index: 2, kind: input, shape index: {}]   ;;  %s3453_s3 = inlined_call_operand.vmem [shape: f32[5,32], index: 3, kind: input, shape index: {}]   ;;  %s3454_s4 = inlined_call_operand.vmem [shape: f32[1,32], index: 4, kind: input, shape index: {}]   ;;  %s3455_s5 = inlined_call_operand.vmem [shape: f32[1,32], index: 5, kind: input, shape index: {}]   ;;  %s3456_s6 = inlined_call_operand.vmem [shape: f32[2,1,32], index: 6, kind: input, shape index: {}]   ;;  %s3457_s7 = inlined_call_operand.vmem [shape: f32[2,1,32], index: 7, kind: input, shape index: {}]   ;;  %s3458_s8 = inlined_call_operand.vmem [shape: f32[2,32,96], index: 8, kind: input, shape index: {}]   ;;  %s3459_s9 = inlined_call_operand.vmem [shape: f32[2,1,96], index: 9, kind: input, shape index: {}]   ;;  %s3460_s10 = inlined_call_operand.vmem [shape: f32[2,32,32], index: 10, kind: input, shape index: {}]   ;;  %s3461_s11 = inlined_call_operand.vmem [shape: f32[2,1,32], index: 11, kind: input, shape index: {}]   ;;  %s3462_s12 = inlined_call_operand.vmem [shape: f32[2,1,32], index: 12, kind: input, shape index: {}]   ;;  %s3463_s13 = inlined_call_operand.vmem [shape: f32[2,1,32], index: 13, kind: input, shape index: {}]   ;;  %s3464_s14 = inlined_call_operand.vmem [shape: f32[2,32,128], index: 14, kind: input, shape index: {}]   ;;  %s3465_s15 = inlined_call_operand.vmem [shape: f32[2,1,128], index: 15, kind: input, shape index: {}]   ;;  %s3466_s16 = inlined_call_operand.vmem [shape: f32[2,128,32], index: 16, kind: input, shape index: {}]   ;;  %s3467_s17 = inlined_call_operand.vmem [shape: f32[2,1,32], index: 17, kind: input, shape index: {}]   ;;  %s3468_s18 = inlined_call_operand.vmem [shape: f32[1,32], index: 18, kind: input, shape index: {}]   ;;  %s3469_s19 = inlined_call_operand.vmem [shape: f32[1,32], index: 19, kind: input, shape index: {}]   ;;  %s3470_s20 = inlined_call_operand.vmem [shape: f32[32,16], index: 20, kind: input, shape index: {}]   ;;  %s3471_s21 = inlined_call_operand.vmem [shape: f32[1,32], index: 21, kind: input, shape index: {}]   ;;  %s3472_s22 = inlined_call_operand.vmem [shape: f32[1,32], index: 22, kind: input, shape index: {}]   ;;  %s3473_s23 = inlined_call_operand.vmem [shape: f32[1,16], index: 23, kind: input, shape index: {}]   ;;  %s3474_s24 = inlined_call_operand.vmem [shape: f32[1,16], index: 24, kind: input, shape index: {}]   ;;  %s3475_s25 = inlined_call_operand.hbm [shape: f32[2,1,128], index: 25, kind: output, shape index: {}]  }
   0x1   :  { %3509 = sst [smem:[#allocation14_spill]] %s3450_s0 }
   0x2   :  { %3510 = sst [smem:[#allocation15_spill]] %s3451_s1 }
   0x3   :  { %3511 = sst [smem:[#allocation16_spill]] %s3452_s2 }
   0x4   :  { %3512 = sst [smem:[#allocation17_spill]] %s3453_s3 }
   0x5   :  { %3513 = sst [smem:[#allocation18_spill]] %s3454_s4 }
   0x6   :  { %3514 = sst [smem:[#allocation19_spill]] %s3455_s5 }
   0x7   :  { %3515 = sst [smem:[#allocation20_spill]] %s3456_s6 }
   0x8   :  { %3516 = sst [smem:[#allocation21_spill]] %s3457_s7 }
   0x9   :  { %3517 = sst [smem:[#allocation22_spill]] %s3458_s8 }
   0xa   :  { %3518 = sst [smem:[#allocation23_spill]] %s3459_s9 }
   0xb   :  { %3519 = sst [smem:[#allocation24_spill]] %s3460_s10 }
   0xc   :  { %3520 = sst [smem:[#allocation25_spill]] %s3461_s11 }
   0xd   :  { %3521 = sst [smem:[#allocation26_spill]] %s3462_s12 }
   0xe   :  { %3522 = sst [smem:[#allocation27_spill]] %s3475_s25 }
   0xf   :  { %30 = vsyncpa [#allocation5], 0 }
  0x10   :  { %32 = vsyncpa [#allocation5 + $0x1], 0  ;;  %s2639_s29 = smov 0   ;;  %s2641_s2 = smov 0  }
  0x11   :  { %s2643_s6 = smov 0   ;;  %s2645_s30 = smov 0  }
  0x12 LB: > { %3523 = sst [smem:[#allocation7_spill]] %s2478_s29  ;;  %s2660_s7 = sadd.s32 4294967295, %s2490_s30   ;;  %s2490_s30 = sphi %s2645_s30, %s3565_s30   ;;  %s2486_s6 = sphi %s2643_s6, %s3570_s6   ;;  %s2482_s2 = sphi %s2641_s2, %s3569_s2   ;;  %s2478_s29 = sphi %s2639_s29, %s3568_s29  }
  0x13   : > { %3524 = sst [smem:[#allocation8_spill]] %s2486_s6  ;;  %s2217_s3 = sadd.s32 4294967294, %s2490_s30  }
  0x14   : > { %3525 = sst [smem:[#allocation9_spill]] %s2490_s30  ;;  %s2664_s26 = sadd.s32 1, %s2490_s30  }
  0x15   : > { %3526 = sst [smem:[#allocation10_spill]] %s2664_s26  ;;  %s575_s1 = sadd.s32 1, %s2486_s6 }
  0x16   : > { %s572_s8 = ssub.s32 %s2490_s30, %s2664_s26  ;;  %p585_p0 = scmp.ne.s32.totalorder %s2486_s6, %s2482_s2 }
  0x17   : > { %p573_p1 = scmp.eq.s32.totalorder %s572_s8, 0  ;;  %p586_p2 = scmp.eq.s32.totalorder %s2660_s7, 1 }
  0x18   : > { %p591_p3 = scmp.ne.s32.totalorder %s2482_s2, %s2478_s29  ;;  %p592_p4 = scmp.eq.s32.totalorder %s2217_s3, 1 }
  0x19   : > { %s2675_s27 = scalar_select %p573_p1, %s2486_s6, %s575_s1  }
  0x1a   : > { %p2677_p5 = por %p586_p2, %p585_p0  ;;  %p2681_p6 = por %p592_p4, %p591_p3 }
  0x1b   : > { %3527 = sst [smem:[#allocation11_spill]] %s2675_s27  ;;  %p2220_p7 = scmp.ge.s32.totalorder %s2490_s30, 1 }
  0x1c   : > { %s3528_s4 = scalar_select %p2677_p5, 1, 0 }
  0x1d   : > { %s3530_s28 = scalar_select %p2681_p6, 1, 0 }
  0x1e   : > { %3529 = sst [smem:[#allocation12_spill]] %s3528_s4  ;;  %p690_p8 = scmp.lt.s32.totalorder %s2490_s30, 3 }
  0x1f   : > { %3531 = sst [smem:[#allocation13_spill]] %s3530_s28 }
  0x20   : > { %p691_p9 = pnand %p2220_p7, %p690_p8 }
  0x21   : > { %s3532_s0 = sld [smem:[#allocation15_spill]] (!%p691_p9)  ;;  %p757_p10 = scmp.lt.s32.totalorder (!%p691_p9), %s2660_s7, 1 }
  0x22   : > { %694 = sbr.rel (%p691_p9) target bundleno = 5165 (0x142d), region = 120  ;;  %s3534_s28 = sld [smem:[#allocation16_spill]] (!%p691_p9) }
  0x23   : > { %s3535_s9 = sld [smem:[#allocation17_spill]] (!%p691_p9)  ;;  %s3500_s26 = smov (!%p691_p9), 96  }
  0x24   : > { %s3536_s1 = sld [smem:[#allocation18_spill]] (!%p691_p9)  ;;  %s3496_s30 = smov (!%p691_p9), 72  }
  0x25   : > { %s3537_s29 = sld [smem:[#allocation19_spill]] (!%p691_p9)  ;;  %s3493_s5 = smov (!%p691_p9), 104  }
  0x26   : > { %s3538_s4 = sld [smem:[#allocation22_spill]] (!%p691_p9) }
  0x27   : > { %v780_v0 = vld [vmem:[%s3532_s0 + $0x78] sm:$0xff]  ;;  %v779_v1 = vld [vmem:[%s3532_s0 + $0x70] sm:$0xff]  ;;  %v778_v4 = vld [vmem:[%s3532_s0 + $0x68] sm:$0xff]  ;;  %s2790_s6 = scalar_select %p757_p10, %s2660_s7, 1  ;;  %vm864_vm0 = vcmask 253952   ;;  %vm1007_vm1 = vcmask 257024  }
  0x28   : > { %v796_v2 = vld [vmem:[%s3532_s0 + $0xf8] sm:$0xff]  ;;  %887 = vmatpush.msra.mxu0 %v780_v0  ;;  %v795_v3 = vld [vmem:[%s3532_s0 + $0xf0] sm:$0xff]  ;;  %v794_v5 = vld [vmem:[%s3532_s0 + $0xe8] sm:$0xff]  ;;  %vm1012_vm2 = vcmask 258048   ;;  %s3541_s25 = sld [smem:[#allocation21_spill]]  ;;  %vm1090_vm10 = vcmask 261120  }
  0x29   : > { %907 = vmatpush.msra.mxu1 %v796_v2  ;;  %v777_v6 = vld [vmem:[%s3532_s0 + $0x60] sm:$0xff]  ;;  %v776_v8 = vld [vmem:[%s3532_s0 + $0x58] sm:$0xff]  ;;  %v775_v10 = vld [vmem:[%s3532_s0 + $0x50] sm:$0xff]  ;;  %s2299_s3 = smul.u32 24, %s2790_s6  ;;  %s3533_s6 = sld [smem:[#allocation14_spill]]  ;;  %vm1117_vm11 = vcmask 64512  }
  0x2a   : > { %888 = vmatpush.msra.mxu0 %v779_v1  ;;  %v793_v7 = vld [vmem:[%s3532_s0 + $0xe0] sm:$0xff]  ;;  %v792_v9 = vld [vmem:[%s3532_s0 + $0xd8] sm:$0xff]  ;;  %v791_v12 = vld [vmem:[%s3532_s0 + $0xd0] sm:$0xff]  ;;  %s3542_s27 = sld [smem:[#allocation23_spill]]  ;;  %vm1143_vm12 = vcmask 36864   ;;  %vm1161_vm13 = vcmask 1044480  }
  0x2b   : > { %908 = vmatpush.msra.mxu1 %v795_v3  ;;  %v812_v11 = vld [vmem:[%s3532_s0 + $0x178] sm:$0xff]  ;;  %v811_v13 = vld [vmem:[%s3532_s0 + $0x170] sm:$0xff]  ;;  %v810_v15 = vld [vmem:[%s3532_s0 + $0x168] sm:$0xff]  ;;  %vm1157_vm14 = vcmask 39936   ;;  %vm1184_vm15 = vcmask 61440   ;;  %s3543_s10 = sld [smem:[#allocation24_spill]] }
  0x2c   : > { %889 = vmatpush.msra.mxu0 %v778_v4  ;;  %927 = vmatpush.msra.mxu2 %v812_v11  ;;  %v828_v14 = vld [vmem:[%s3532_s0 + $0x1f8] sm:$0xff]  ;;  %v827_v16 = vld [vmem:[%s3532_s0 + $0x1f0] sm:$0xff]  ;;  %v774_v17 = vld [vmem:[%s3532_s0 + $0x48] sm:$0xff]  ;;  %s3544_s11 = sld [smem:[#allocation25_spill]] }
  0x2d   : > { %909 = vmatpush.msra.mxu1 %v794_v5  ;;  %v790_v18 = vld [vmem:[%s3532_s0 + $0xc8] sm:$0xff]  ;;  %947 = vmatpush.msra.mxu3 %v828_v14  ;;  %v809_v19 = vld [vmem:[%s3532_s0 + $0x160] sm:$0xff]  ;;  %v808_v23 = vld [vmem:[%s3532_s0 + $0x158] sm:$0xff]  ;;  %s3545_s12 = sld [smem:[#allocation26_spill]] }
  0x2e   : > { %890 = vmatpush.msra.mxu0 %v777_v6  ;;  %928 = vmatpush.msra.mxu2 %v811_v13  ;;  %v826_v20 = vld [vmem:[%s3532_s0 + $0x1e8] sm:$0xff]  ;;  %v773_v21 = vld [vmem:[%s3532_s0 + $0x40] sm:$0xff]  ;;  %v772_v25 = vld [vmem:[%s3532_s0 + $0x38] sm:$0xff] }
  0x2f   : > { %910 = vmatpush.msra.mxu1 %v793_v7  ;;  %v789_v22 = vld [vmem:[%s3532_s0 + $0xc0] sm:$0xff]  ;;  %948 = vmatpush.msra.mxu3 %v827_v16  ;;  %v788_v26 = vld [vmem:[%s3532_s0 + $0xb8] sm:$0xff]  ;;  %v807_v27 = vld [vmem:[%s3532_s0 + $0x150] sm:$0xff]  ;;  %s2844_s8 = scalar_lea.vmem %s3533_s6, %s2299_s3  ;;  %s3497_s6 = smov 56  }
  0x30   : > { %891 = vmatpush.msra.mxu0 %v776_v8  ;;  %929 = vmatpush.msra.mxu2 %v810_v15  ;;  %v825_v24 = vld [vmem:[%s3532_s0 + $0x1e0] sm:$0xff]  ;;  %v824_v28 = vld [vmem:[%s3532_s0 + $0x1d8] sm:$0xff]  ;;  %v771_v29 = vld [vmem:[%s3532_s0 + $0x30] sm:$0xff] }
  0x31   : > { %911 = vmatpush.msra.mxu1 %v792_v9  ;;  %949 = vmatpush.msra.mxu3 %v826_v20  ;;  %v787_v30 = vld [vmem:[%s3532_s0 + $0xb0] sm:$0xff]  ;;  %v806_v31 = vld [vmem:[%s3532_s0 + $0x148] sm:$0xff]  ;;  %v805_v35 = vld [vmem:[%s3532_s0 + $0x140] sm:$0xff] }
  0x32   : > { %892 = vmatpush.msra.mxu0 %v775_v10  ;;  %930 = vmatpush.msra.mxu2 %v809_v19  ;;  %v823_v32 = vld [vmem:[%s3532_s0 + $0x1d0] sm:$0xff]  ;;  %v770_v33 = vld [vmem:[%s3532_s0 + $0x28] sm:$0xff]  ;;  %v769_v37 = vld [vmem:[%s3532_s0 + $0x20] sm:$0xff] }
  0x33   : > { %912 = vmatpush.msra.mxu1 %v791_v12  ;;  %950 = vmatpush.msra.mxu3 %v825_v24  ;;  %v786_v34 = vld [vmem:[%s3532_s0 + $0xa8] sm:$0xff]  ;;  %v785_v38 = vld [vmem:[%s3532_s0 + $0xa0] sm:$0xff]  ;;  %v804_v39 = vld [vmem:[%s3532_s0 + $0x138] sm:$0xff] }
  0x34   : > { %893 = vmatpush.msra.mxu0 %v774_v17  ;;  %931 = vmatpush.msra.mxu2 %v808_v23  ;;  %v822_v36 = vld [vmem:[%s3532_s0 + $0x1c8] sm:$0xff]  ;;  %v821_v40 = vld [vmem:[%s3532_s0 + $0x1c0] sm:$0xff]  ;;  %v768_v41 = vld [vmem:[%s3532_s0 + $0x18] sm:$0xff] }
  0x35   : > { %913 = vmatpush.msra.mxu1 %v790_v18  ;;  %951 = vmatpush.msra.mxu3 %v824_v28  ;;  %v784_v42 = vld [vmem:[%s3532_s0 + $0x98] sm:$0xff]  ;;  %v803_v43 = vld [vmem:[%s3532_s0 + $0x130] sm:$0xff]  ;;  %v802_v47 = vld [vmem:[%s3532_s0 + $0x128] sm:$0xff] }
  0x36   : > { %894 = vmatpush.msra.mxu0 %v773_v21  ;;  %932 = vmatpush.msra.mxu2 %v807_v27  ;;  %v820_v44 = vld [vmem:[%s3532_s0 + $0x1b8] sm:$0xff]  ;;  %v767_v45 = vld [vmem:[%s3532_s0 + $0x10] sm:$0xff]  ;;  %v766_v49 = vld [vmem:[%s3532_s0 + $0x8] sm:$0xff] }
  0x37   : > { %914 = vmatpush.msra.mxu1 %v789_v22  ;;  %952 = vmatpush.msra.mxu3 %v823_v32  ;;  %v783_v46 = vld [vmem:[%s3532_s0 + $0x90] sm:$0xff]  ;;  %v782_v50 = vld [vmem:[%s3532_s0 + $0x88] sm:$0xff]  ;;  %v801_v51 = vld [vmem:[%s3532_s0 + $0x120] sm:$0xff] }
  0x38   : > { %895 = vmatpush.msra.mxu0 %v772_v25  ;;  %933 = vmatpush.msra.mxu2 %v806_v31  ;;  %v819_v48 = vld [vmem:[%s3532_s0 + $0x1b0] sm:$0xff]  ;;  %v818_v52 = vld [vmem:[%s3532_s0 + $0x1a8] sm:$0xff]  ;;  %v765_v53 = vld [vmem:[%s3532_s0] sm:$0xff] }
  0x39   : > { %915 = vmatpush.msra.mxu1 %v788_v26  ;;  %953 = vmatpush.msra.mxu3 %v822_v36  ;;  %v781_v54 = vld [vmem:[%s3532_s0 + $0x80] sm:$0xff]  ;;  %v763_v55 = vld [vmem:[%s2844_s8 + $0x8] sm:$0xff]  ;;  %v844_v56 = vld [vmem:[%s3532_s0 + $0x278] sm:$0xff] }
  0x3a   : > { %896 = vmatpush.msra.mxu0 %v771_v29  ;;  %934 = vmatpush.msra.mxu2 %v805_v35  ;;  %v860_v57 = vld [vmem:[%s3532_s0 + $0x2f8] sm:$0xff]  ;;  %872 = vst [vmem:[#allocation1 + $0x10] ss:$2 sm:$0xff] %v763_v55  ;;  %v762_v58 = vld [vmem:[%s2844_s8] sm:$0xff]  ;;  %v843_v59 = vld [vmem:[%s3532_s0 + $0x270] sm:$0xff] }
  0x3b   : > { %916 = vmatpush.msra.mxu1 %v787_v30  ;;  %954 = vmatpush.msra.mxu3 %v821_v40  ;;  %v800_v60 = vld [vmem:[%s3532_s0 + $0x118] sm:$0xff]  ;;  %v817_v61 = vld [vmem:[%s3532_s0 + $0x1a0] sm:$0xff]  ;;  %870 = vst [vmem:[#allocation1] ss:$2 sm:$0xff] %v762_v58  ;;  %v842_v62 = vld [vmem:[%s3532_s0 + $0x268] sm:$0xff] }
  0x3c   : > { %897 = vmatpush.msra.mxu0 %v770_v33  ;;  %935 = vmatpush.msra.mxu2 %v804_v39  ;;  %v859_v63 = vld [vmem:[%s3532_s0 + $0x2f0] sm:$0xff]  ;;  %v858_v0 = vld [vmem:[%s3532_s0 + $0x2e8] sm:$0xff]  ;;  %v816_v2 = vld [vmem:[%s3532_s0 + $0x198] sm:$0xff] }
  0x3d   : > { %917 = vmatpush.msra.mxu1 %v786_v34  ;;  %955 = vmatpush.msra.mxu3 %v820_v44  ;;  %v799_v1 = vld [vmem:[%s3532_s0 + $0x110] sm:$0xff]  ;;  %v841_v4 = vld [vmem:[%s3532_s0 + $0x260] sm:$0xff]  ;;  %v798_v6 = vld [vmem:[%s3532_s0 + $0x108] sm:$0xff] }
  0x3e   : > { %898 = vmatpush.msra.mxu0 %v769_v37  ;;  %936 = vmatpush.msra.mxu2 %v803_v43  ;;  %v764_v3 = vld [vmem:[%s2844_s8 + $0x10] sm:$0xff]  ;;  %v857_v5 = vld [vmem:[%s3532_s0 + $0x2e0] sm:$0xff]  ;;  %v840_v8 = vld [vmem:[%s3532_s0 + $0x258] sm:$0xff]  ;;  %s3504_s8 = smov 120  }
  0x3f   : > { %918 = vmatpush.msra.mxu1 %v785_v38  ;;  %956 = vmatpush.msra.mxu3 %v819_v48  ;;  %v815_v7 = vld [vmem:[%s3532_s0 + $0x190] sm:$0xff]  ;;  %874 = vst [vmem:[#allocation1 + $0x20] ss:$2 sm:$0xff] %v764_v3  ;;  %v856_v9 = vld [vmem:[%s3532_s0 + $0x2d8] sm:$0xff]  ;;  %v797_v10 = vld [vmem:[%s3532_s0 + $0x100] sm:$0xff] }
  0x40   : > { %899 = vmatpush.msra.mxu0 %v768_v41  ;;  %937 = vmatpush.msra.mxu2 %v802_v47  ;;  %v814_v11 = vld [vmem:[%s3532_s0 + $0x188] sm:$0xff]  ;;  %v839_v12 = vld [vmem:[%s3532_s0 + $0x250] sm:$0xff]  ;;  %v813_v15 = vld [vmem:[%s3532_s0 + $0x180] sm:$0xff] }
  0x41   : > { %919 = vmatpush.msra.mxu1 %v784_v42  ;;  %957 = vmatpush.msra.mxu3 %v818_v52  ;;  %v855_v13 = vld [vmem:[%s3532_s0 + $0x2d0] sm:$0xff]  ;;  %v878_v16 = vld.sshfl [vmem:[#allocation1 + $0x18] sm:$0xff pattern:$0x75316420]  ;;  %v838_v17 = vld [vmem:[%s3532_s0 + $0x248] sm:$0xff] }
  0x42   : > { %900 = vmatpush.msra.mxu0 %v767_v45  ;;  %938 = vmatpush.msra.mxu2 %v801_v51  ;;  %v877_v14 = vld.sshfl [vmem:[#allocation1 + $0x10] sm:$0xff pattern:$0x75316420]  ;;  %v854_v18 = vld [vmem:[%s3532_s0 + $0x2c8] sm:$0xff]  ;;  %v837_v21 = vld [vmem:[%s3532_s0 + $0x240] sm:$0xff] }
  0x43   : > { %920 = vmatpush.msra.mxu1 %v783_v46  ;;  %958 = vmatpush.msra.mxu3 %v817_v61  ;;  %v875_v19 = vld.sshfl [vmem:[#allocation1] sm:$0xff pattern:$0x75316420]  ;;  %v876_v20 = vld.sshfl [vmem:[#allocation1 + $0x8] sm:$0xff pattern:$0x75316420] }
  0x44   : > { %901 = vmatpush.msra.mxu0 %v766_v49  ;;  %939 = vmatpush.msra.mxu2 %v800_v60  ;;  %v853_v22 = vld [vmem:[%s3532_s0 + $0x2c0] sm:$0xff]  ;;  %v836_v23 = vld [vmem:[%s3532_s0 + $0x238] sm:$0xff]  ;;  %v835_v25 = vld [vmem:[%s3532_s0 + $0x230] sm:$0xff] }
  0x45   : > { %921 = vmatpush.msra.mxu1 %v782_v50  ;;  %959 = vmatpush.msra.mxu3 %v816_v2  ;;  %v852_v24 = vld [vmem:[%s3532_s0 + $0x2b8] sm:$0xff]  ;;  %v851_v26 = vld [vmem:[%s3532_s0 + $0x2b0] sm:$0xff]  ;;  %v834_v27 = vld [vmem:[%s3532_s0 + $0x228] sm:$0xff] }
  0x46   : > { %902 = vmatpush.msra.mxu0 %v765_v53  ;;  %940 = vmatpush.msra.mxu2 %v799_v1  ;;  %v850_v28 = vld [vmem:[%s3532_s0 + $0x2a8] sm:$0xff]  ;;  %v833_v29 = vld [vmem:[%s3532_s0 + $0x220] sm:$0xff]  ;;  %v832_v31 = vld [vmem:[%s3532_s0 + $0x218] sm:$0xff] }
  0x47   : > { %922 = vmatpush.msra.mxu1 %v781_v54  ;;  %960 = vmatpush.msra.mxu3 %v815_v7  ;;  %v849_v30 = vld [vmem:[%s3532_s0 + $0x2a0] sm:$0xff]  ;;  %v848_v32 = vld [vmem:[%s3532_s0 + $0x298] sm:$0xff]  ;;  %v831_v33 = vld [vmem:[%s3532_s0 + $0x210] sm:$0xff] }
  0x48   : > { %967 = vmatpush.msrb.mxu0 %v844_v56  ;;  %941 = vmatpush.msra.mxu2 %v798_v6  ;;  %v847_v34 = vld [vmem:[%s3532_s0 + $0x290] sm:$0xff]  ;;  %v830_v35 = vld [vmem:[%s3532_s0 + $0x208] sm:$0xff]  ;;  %v829_v37 = vld [vmem:[%s3532_s0 + $0x200] sm:$0xff] }
  0x49   : > { %987 = vmatpush.msrb.mxu1 %v860_v57  ;;  %961 = vmatpush.msra.mxu3 %v814_v11  ;;  %v846_v36 = vld [vmem:[%s3532_s0 + $0x288] sm:$0xff]  ;;  %v845_v38 = vld [vmem:[%s3532_s0 + $0x280] sm:$0xff]  ;;  %s3554_s0 = smov 80  }
  0x4a   : > { %968 = vmatpush.msrb.mxu0 %v843_v59  ;;  %942 = vmatpush.msra.mxu2 %v797_v10  ;;  %v879_v39 = vld.sshfl [vmem:[#allocation1 + $0x20] sm:$0xff pattern:$0x75316420]  ;;  %v880_v40 = vld.sshfl [vmem:[#allocation1 + $0x28] sm:$0xff pattern:$0x75316420] }
  0x4b   : > { %988 = vmatpush.msrb.mxu1 %v859_v63  ;;  %943 = vmatmul.f32.vlgmr.msra.gmra.mxu2 %v877_v14  ;;  %v861_v41 = vld [vmem:[%s3534_s28] sm:$0x1]  ;;  %v866_v44 = vld [vmem:[%s3535_s9 + $0x1] sm:$0xf]  ;;  %v2492_v59 = vmov 32.0   ;;  %s3492_s28 = smov 112  }
  0x4c   : > { %969 = vmatpush.msrb.mxu0 %v842_v62  ;;  %962 = vmatpush.msra.mxu3 %v813_v15  ;;  %v862_v42 = vld [vmem:[%s3535_s9] sm:$0x1]  ;;  %2374 = vrcp.f32 %v2492_v59  ;;  %s3555_s9 = smov 40  }
  0x4d   : > { %989 = vmatpush.msrb.mxu1 %v858_v0  ;;  %903 = vmatmul.f32.vlgmr.msra.gmra.mxu0 %v875_v19  ;;  %v863_v43 = vadd.f32 %v862_v42, %v861_v41  ;;  %v2357_v19 = vld [vmem:[%s3537_s29] ss:$0 sm:$0xff]  ;;  %s3539_s29 = sld [smem:[#allocation20_spill]] }
  0x4e   : > { %970 = vmatpush.msrb.mxu0 %v841_v4  ;;  %963 = vmatmul.f32.vlgmr.msra.gmra.mxu3 %v878_v16  ;;  %v2356_v16 = vld [vmem:[%s3536_s1] ss:$0 sm:$0xff]  ;;  %s3491_s1 = smov 80  }
  0x4f   : > { %990 = vmatpush.msrb.mxu1 %v857_v5  ;;  %865 = vst.msk [vmem:[#allocation2] sm:$0x1] %vm864_vm0, %v863_v43 }
  0x50   : > { %971 = vmatpush.msrb.mxu0 %v840_v8  ;;  %923 = vmatmul.f32.vlgmr.msra.gmra.mxu1 %v876_v20 }
  0x51   : > { %991 = vmatpush.msrb.mxu1 %v856_v9 }
  0x52   : > { %972 = vmatpush.msrb.mxu0 %v839_v12  ;;  %v2375_v60 = vpop.eup %2374 }
  0x53   : > { %992 = vmatpush.msrb.mxu1 %v855_v13  ;;  %v1017_v61 = vmul.f32 32.0, %v2375_v60  ;;  %vm1021_vm3 = vweird.f32 %v2375_v60  ;;  %s3540_s3 = smov %s3539_s29  ;;  %v2358_v41 = vld [vmem:[%s3539_s29] ss:$0 sm:$0xff]  ;;  %s3502_s29 = smov 88  }
  0x54   : > { %973 = vmatpush.msrb.mxu0 %v838_v17 }
  0x55   : > { %993 = vmatpush.msrb.mxu1 %v854_v18  ;;  %v1018_v62 = vsub.f32 1.0, %v1017_v61 }
  0x56   : > { %974 = vmatpush.msrb.mxu0 %v837_v21 }
  0x57   : > { %994 = vmatpush.msrb.mxu1 %v853_v22  ;;  %v1019_v63 = vmul.f32 %v2375_v60, %v1018_v62 }
  0x58   : > { %975 = vmatpush.msrb.mxu0 %v836_v23 }
  0x59   : > { %995 = vmatpush.msrb.mxu1 %v852_v24  ;;  %v1020_v0 = vadd.f32 %v2375_v60, %v1019_v63 }
  0x5a   : > { %976 = vmatpush.msrb.mxu0 %v835_v25 }
  0x5b   : > { %996 = vmatpush.msrb.mxu1 %v851_v26  ;;  %v3001_v1 = vsel %vm1021_vm3, %v2375_v60, %v1020_v0  ;;  %vm1330_vm3 = vcmask 192640  }
  0x5c   : > { %977 = vmatpush.msrb.mxu0 %v834_v27 }
  0x5d   : > { %997 = vmatpush.msrb.mxu1 %v850_v28  ;;  %v1085_v28 = vld [vmem:[%s3538_s4 + $0x18] sm:$0xff] }
  0x5e   : > { %978 = vmatpush.msrb.mxu0 %v833_v29  ;;  %v1084_v29 = vld [vmem:[%s3538_s4 + $0x10] sm:$0xff] }
  0x5f   : > { %998 = vmatpush.msrb.mxu1 %v849_v30  ;;  %v1083_v30 = vld [vmem:[%s3538_s4 + $0x8] sm:$0xff] }
  0x60   : > { %979 = vmatpush.msrb.mxu0 %v832_v31  ;;  %v1082_v31 = vld [vmem:[%s3538_s4] sm:$0xff] }
  0x61   : > { %999 = vmatpush.msrb.mxu1 %v848_v32 }
  0x62   : > { %980 = vmatpush.msrb.mxu0 %v831_v33 }
  0x63   : > { %1000 = vmatpush.msrb.mxu1 %v847_v34 }
  0x64   : > { %981 = vmatpush.msrb.mxu0 %v830_v35 }
  0x65   : > { %1001 = vmatpush.msrb.mxu1 %v846_v36 }
  0x66   : > { %982 = vmatpush.msrb.mxu0 %v829_v37 }
  0x67   : > { %1002 = vmatpush.msrb.mxu1 %v845_v38  ;;  %983 = vmatmul.f32.vlgmr.msrb.gmra.mxu0 %v879_v39 }
  0x68   : > { %1003 = vmatmul.f32.vlgmr.msrb.gmra.mxu1 %v880_v40  ;;  %1106 = vmatpush.msra.mxu0 %v1085_v28 }
  0x6a   : > { %1107 = vmatpush.msra.mxu0 %v1084_v29 }
  0x6c   : > { %1108 = vmatpush.msra.mxu0 %v1083_v30 }
  0x6e   : > { %1109 = vmatpush.msra.mxu0 %v1082_v31 }
  0xca   : > { %v904_v45 = vpop.f32.mrf.mxu0 }
  0xcb   : > { %v905_v46 = vadd.f32 %v904_v45, %v866_v44  ;;  %v2359_v44 = vld [vmem:[%s3541_s25] ss:$0 sm:$0xff] }
  0xcd   : > { %v924_v47 = vpop.f32.mrf.mxu1 }
  0xce   : > { %v925_v48 = vadd.f32 %v924_v47, %v905_v46  ;;  %v944_v49 = vpop.f32.mrf.mxu2  ;;  %v2360_v47 = vld [vmem:[%s3542_s27] ss:$0 sm:$0xff] }
  0xd0   : > { %v945_v50 = vadd.f32 %v944_v49, %v925_v48 }
  0xd1   : > { %v964_v51 = vpop.f32.mrf.mxu3 }
  0xd2   : > { %v965_v52 = vadd.f32 %v964_v51, %v945_v50 }
  0xe4   : > { %v984_v53 = vpop.f32.mrf.mxu0 }
  0xe5   : > { %v1004_v54 = vpop.f32.mrf.mxu1  ;;  %v985_v55 = vadd.f32 %v984_v53, %v965_v52 }
  0xe7   : > { %v1005_v56 = vadd.f32 %v1004_v54, %v985_v55 }
  0xe9   : > { %1008 = vst.msk [vmem:[#allocation2 + $0x1] sm:$0xf] %vm1007_vm1, %v1005_v56  ;;  %vm1257_vm1 = vcmask 127040  }
  0xf0   : > { %v1009_v57 = vld [vmem:[#allocation2] sm:$0x1f] }
  0xf1   : > { %v1013_v58 = vsel %vm1012_vm2, %v1009_v57, 0.0 }
  0xf2   : > { %1014 = vadd.xlane.f32.xlu0 %v1013_v58 }
 0x165   : > { %v1015_v2 = vpop.xlane.xlu0 %1014 }
 0x166   : > { %v1023_v3 = vmul.f32 %v3001_v1, %v1015_v2 }
 0x168   : > { %v1024_v4 = vsub.f32 %v1009_v57, %v1023_v3 }
 0x16a   : > { %v1025_v5 = vmul.f32 %v1024_v4, %v1024_v4 }
 0x16c   : > { %v1026_v6 = vsel %vm1012_vm2, %v1025_v5, 0.0 }
 0x16d   : > { %1027 = vadd.xlane.f32.xlu0 %v1026_v6 }
 0x1e0   : > { %v1028_v7 = vpop.xlane.xlu0 %1027 }
 0x1e1   : > { %v1029_v8 = vmul.f32 %v1028_v7, %v3001_v1 }
 0x1e3   : > { %v1030_v9 = vadd.f32 1e-05, %v1029_v8 }
 0x1e5   : > { %2376 = vrsqrt.f32 %v1030_v9  ;;  %vm1037_vm5 = vweird.f32 %v1030_v9 }
 0x1eb   : > { %v2377_v10 = vpop.eup %2376 }
 0x1ec   : > { %v1032_v11 = vmul.f32 %v2377_v10, %v1030_v9  ;;  %vm1038_vm4 = vweird.f32 %v2377_v10 }
 0x1ed   : > { %vm1039_vm6 = vmor %vm1037_vm5, %vm1038_vm4  ;;  %vm1403_vm4 = vcmask 258240  }
 0x1ee   : > { %v1033_v12 = vmul.f32 %v2377_v10, %v1032_v11 }
 0x1f0   : > { %v1034_v13 = vmul.f32 0.5, %v1033_v12 }
 0x1f2   : > { %v1035_v14 = vsub.f32 1.5, %v1034_v13 }
 0x1f4   : > { %v1036_v15 = vmul.f32 %v2377_v10, %v1035_v14 }
 0x1f6   : > { %v1040_v17 = vsel %vm1039_vm6, %v2377_v10, %v1036_v15 }
 0x1f7   : > { %v1041_v18 = vmul.f32 %v1040_v17, %v1024_v4 }
 0x1f9   : > { %v1045_v20 = vmul.f32 %v2356_v16, %v1041_v18 }
 0x1fb   : > { %v3012_v21 = vadd.f32 %v2357_v19, %v1045_v20 }
 0x1fd   : > { %v1052_v22 = vsel %vm1012_vm2, %v3012_v21, 0.0 }
 0x1fe   : > { %1053 = vadd.xlane.f32.xlu1 %v1052_v22 }
 0x271   : > { %v1054_v23 = vpop.xlane.xlu1 %1053 }
 0x272   : > { %v1055_v24 = vmul.f32 %v1054_v23, %v3001_v1 }
 0x274   : > { %v1056_v25 = vsub.f32 %v3012_v21, %v1055_v24 }
 0x276   : > { %v1057_v26 = vmul.f32 %v1056_v25, %v1056_v25 }
 0x278   : > { %v1058_v27 = vsel %vm1012_vm2, %v1057_v26, 0.0 }
 0x279   : > { %1059 = vadd.xlane.f32.xlu1 %v1058_v27 }
 0x2ec   : > { %v1060_v32 = vpop.xlane.xlu1 %1059 }
 0x2ed   : > { %v1061_v33 = vmul.f32 %v1060_v32, %v3001_v1 }
 0x2ef   : > { %v1062_v34 = vadd.f32 1e-05, %v1061_v33 }
 0x2f1   : > { %2378 = vrsqrt.f32 %v1062_v34  ;;  %vm1069_vm8 = vweird.f32 %v1062_v34 }
 0x2f7   : > { %v2379_v35 = vpop.eup %2378 }
 0x2f8   : > { %v1064_v36 = vmul.f32 %v2379_v35, %v1062_v34  ;;  %vm1070_vm7 = vweird.f32 %v2379_v35 }
 0x2f9   : > { %vm1071_vm9 = vmor %vm1069_vm8, %vm1070_vm7 }
 0x2fa   : > { %v1065_v37 = vmul.f32 %v2379_v35, %v1064_v36 }
 0x2fc   : > { %v1066_v38 = vmul.f32 0.5, %v1065_v37 }
 0x2fe   : > { %v1067_v39 = vsub.f32 1.5, %v1066_v38 }
 0x300   : > { %v1068_v40 = vmul.f32 %v2379_v35, %v1067_v39 }
 0x302   : > { %v1072_v42 = vsel %vm1071_vm9, %v2379_v35, %v1068_v40 }
 0x303   : > { %v1073_v43 = vmul.f32 %v1072_v42, %v1056_v25 }
 0x305   : > { %v1077_v45 = vmul.f32 %v2358_v41, %v1073_v43 }
 0x307   : > { %v1081_v46 = vadd.f32 %v2359_v44, %v1077_v45 }
 0x309   : > { %2222 = vmatmul.msk.f32.vlgmr.msra.gmra.mxu0 %vm1090_vm10, %v1081_v46 }
 0x386   : > { %v1111_v48 = vpop.f32.mrf.mxu0 }
 0x387   : > { %v3042_v49 = vadd.f32 %v2360_v47, %v1111_v48  ;;  %v1409_v48 = vld [vmem:[%s3543_s10 + $0x18] sm:$0xff] }
 0x389   : > { %1261 = vrot.lane.b32.xlu1 %v3042_v49, %s3491_s1  ;;  %1186 = vrot.lane.b32.xlu0 %v3042_v49, %s3504_s8  ;;  %s3494_s1 = smov 48   ;;  %s3550_s8 = smov 56  }
 0x38a   : > { %1115 = vrot.lane.b32.xlu2 %v3042_v49, %s3500_s26  ;;  %s3549_s26 = smov 64  }
 0x392   : > { %1188 = vrot.lane.b32.xlu2 %v3042_v49, %s3502_s29  ;;  %s3551_s29 = smov 72  }
 0x39a   : > { %1259 = vrot.lane.b32.xlu2 %v3042_v49, %s3492_s28  ;;  %s3495_s28 = smov 40  }
 0x3a2   : > { %1334 = vrot.lane.b32.xlu2 %v3042_v49, %s3496_s30  ;;  %s3503_s30 = smov 16  }
 0x3aa   : > { %1332 = vrot.lane.b32.xlu2 %v3042_v49, %s3493_s5  ;;  %s3498_s5 = smov 64  }
 0x3e4   : > { %v1116_v50 = vpop.permute.xlu2 %1115 }
 0x3e5   : > { %2223 = vmatpush.xpose.msk.msrb.mxu3 %vm1117_vm11, %v1116_v50  ;;  %v1407_v50 = vld [vmem:[%s3543_s10 + $0x8] sm:$0xff] }
 0x3e8   : > { %2224 = vmatmul.msk.f32.vlgmr.msrb.gmra.mxu3 %vm1117_vm11, %v3042_v49 }
 0x3ec   : > { %v1189_v51 = vpop.permute.xlu2 %1188 }
 0x3ed   : > { %2227 = vmatpush.xpose.msk.msra.mxu3 %vm1117_vm11, %v1189_v51  ;;  %v1406_v51 = vld [vmem:[%s3543_s10] sm:$0xff] }
 0x3f4   : > { %v1260_v52 = vpop.permute.xlu2 %1259 }
 0x3fb   : > { %v1262_v53 = vpop.permute.xlu1 %1261  ;;  %v1187_v54 = vpop.permute.xlu0 %1186 }
 0x3fc   : > { %v1335_v55 = vpop.permute.xlu2 %1334  ;;  %2228 = vmatmul.msk.f32.vlgmr.msra.gmra.mxu3 %vm1117_vm11, %v1187_v54 }
 0x3fd   : > { %2231 = vmatpush.xpose.msk.msrb.mxu3 %vm1117_vm11, %v1262_v53 }
 0x401   : > { %2235 = vmatpush.xpose.msk.msra.mxu3 %vm1117_vm11, %v1335_v55  ;;  %v2361_v55 = vld [vmem:[%s3544_s11] ss:$0 sm:$0xff] }
 0x404   : > { %2232 = vmatmul.msk.f32.vlgmr.msrb.gmra.mxu3 %vm1117_vm11, %v1260_v52  ;;  %v1333_v56 = vpop.permute.xlu2 %1332 }
 0x40c   : > { %2236 = vmatmul.msk.f32.vlgmr.msra.gmra.mxu3 %vm1117_vm11, %v1333_v56 }
 0x46b   : > { %v1139_v57 = vpop.f32.mrf.mxu3 }
 0x46c   : > { %v1142_v61 = vmul.f32 0.35355338, %v1139_v57 }
 0x46e   : > { %v1144_v0 = vsel %vm1143_vm12, %v1142_v61, -inf }
 0x47f   : > { %v1211_v58 = vpop.f32.mrf.mxu3 }
 0x480   : > { %v1214_v59 = vmul.f32 0.35355338, %v1211_v58 }
 0x482   : > { %v1215_v60 = vsel %vm1143_vm12, %v1214_v59, -inf }
 0x483   : > { %1216 = vmax.xlane.f32.xlu0 %v1215_v60 }
 0x487   : > { %v1284_v62 = vpop.f32.mrf.mxu3 }
 0x488   : > { %v1287_v63 = vmul.f32 0.35355338, %v1284_v62 }
 0x48a   : > { %v1288_v2 = vsel %vm1143_vm12, %v1287_v63, -inf }
 0x48b   : > { %1145 = vmax.xlane.f32.xlu0 %v1144_v0  ;;  %1289 = vmax.xlane.f32.xlu2 %v1288_v2  ;;  %v1473_v2 = vld [vmem:[%s3464_s14 + $0x18] sm:$0xff] }
 0x48f   : > { %v1357_v3 = vpop.f32.mrf.mxu3 }
 0x490   : > { %v1360_v4 = vmul.f32 0.35355338, %v1357_v3  ;;  %v1471_v3 = vld [vmem:[%s3464_s14 + $0x8] sm:$0xff] }
 0x492   : > { %v1361_v5 = vsel %vm1143_vm12, %v1360_v4, -inf }
 0x493   : > { %1362 = vmax.xlane.f32.xlu1 %v1361_v5 }
 0x49f   : > { %1226 = vrot.lane.b32.xlu0 %v3042_v49, %s3497_s6  ;;  %s3547_s6 = smov 88  }
 0x4f6   : > { %v1217_v6 = vpop.xlane.xlu0 %1216 }
 0x4f7   : > { %v1218_v7 = vsub.f32 %v1214_v59, %v1217_v6 }
 0x4f9   : > { %v1219_v8 = vmul.f32 1.442695, %v1218_v7 }
 0x4fb   : > { %2380 = vpow2.f32 %v1219_v8 }
 0x4fe   : > { %v1146_v9 = vpop.xlane.xlu0 %1145  ;;  %v1290_v10 = vpop.xlane.xlu2 %1289 }
 0x4ff   : > { %v1147_v11 = vsub.f32 %v1142_v61, %v1146_v9  ;;  %v1291_v12 = vsub.f32 %v1287_v63, %v1290_v10 }
 0x501   : > { %v2381_v13 = vpop.eup %2380  ;;  %v1148_v14 = vmul.f32 1.442695, %v1147_v11  ;;  %v1292_v15 = vmul.f32 1.442695, %v1291_v12 }
 0x502   : > { %v1221_v16 = vsel %vm1143_vm12, %v2381_v13, 0.0 }
 0x503   : > { %2382 = vpow2.f32 %v1148_v14  ;;  %1222 = vadd.xlane.f32.xlu2 %v1221_v16  ;;  %v2362_v14 = vld [vmem:[%s3545_s12] ss:$0 sm:$0xff] }
 0x504   : > { %2384 = vpow2.f32 %v1292_v15 }
 0x506   : > { %v1363_v17 = vpop.xlane.xlu1 %1362 }
 0x507   : > { %v1364_v18 = vsub.f32 %v1360_v4, %v1363_v17  ;;  %v1470_v4 = vld [vmem:[%s3464_s14] sm:$0xff] }
 0x508   : > { %v2363_v17 = vld [vmem:[%s3463_s13] ss:$0 sm:$0xff] }
 0x509   : > { %v2383_v19 = vpop.eup %2382  ;;  %v1365_v20 = vmul.f32 1.442695, %v1364_v18 }
 0x50a   : > { %v2385_v22 = vpop.eup %2384  ;;  %v1150_v23 = vsel %vm1143_vm12, %v2383_v19, 0.0 }
 0x50b   : > { %2386 = vpow2.f32 %v1365_v20  ;;  %1151 = vadd.xlane.f32.xlu0 %v1150_v23  ;;  %v1294_v24 = vsel %vm1143_vm12, %v2385_v22, 0.0  ;;  %v1536_v20 = vld [vmem:[%s3466_s16 + $0x78] sm:$0xff]  ;;  %v1534_v23 = vld [vmem:[%s3466_s16 + $0x68] sm:$0xff] }
 0x50c   : > { %1295 = vadd.xlane.f32.xlu1 %v1294_v24  ;;  %1537 = vmatpush.msrb.mxu3 %v1536_v20  ;;  %v1533_v24 = vld [vmem:[%s3466_s16 + $0x60] sm:$0xff] }
 0x50d   : > { %v2368_v20 = vld [vmem:[%s3542_s27 + $0x1] ss:$0 sm:$0xff] }
 0x511   : > { %v2387_v25 = vpop.eup %2386  ;;  %v1227_v26 = vpop.permute.xlu0 %1226 }
 0x512   : > { %2229 = vmatpush.msk.msrb.mxu2 %vm1161_vm13, %v1227_v26  ;;  %v1367_v27 = vsel %vm1143_vm12, %v2387_v25, 0.0  ;;  %v1531_v26 = vld [vmem:[%s3466_s16 + $0x50] sm:$0xff] }
 0x513   : > { %1368 = vadd.xlane.f32.xlu2 %v1367_v27  ;;  %v1530_v27 = vld [vmem:[%s3466_s16 + $0x48] sm:$0xff] }
 0x525   : > { %1299 = vrot.lane.b32.xlu1 %v3042_v49, %s3494_s1  ;;  %s3499_s1 = smov 8  }
 0x52b   : > { %1372 = vrot.lane.b32.xlu2 %v3042_v49, %s3495_s28  ;;  %s3501_s28 = smov 24  }
 0x52d   : > { %1155 = vrot.lane.b32.xlu1 %v3042_v49, %s3498_s5  ;;  %v1408_v49 = vld [vmem:[%s3543_s10 + $0x10] sm:$0xff]  ;;  %s3546_s5 = smov 120  }
 0x576   : > { %v1223_v28 = vpop.xlane.xlu2 %1222 }
 0x577   : > { %2388 = vrcp.f32 %v1223_v28  ;;  %v1529_v28 = vld [vmem:[%s3466_s16 + $0x40] sm:$0xff] }
 0x57d   : > { %v2389_v29 = vpop.eup %2388 }
 0x57e   : > { %v1225_v30 = vmul.f32 %v2389_v29, %v2381_v13  ;;  %v1152_v36 = vpop.xlane.xlu0 %1151  ;;  %v1528_v29 = vld [vmem:[%s3466_s16 + $0x38] sm:$0xff] }
 0x57f   : > { %v1296_v32 = vpop.xlane.xlu1 %1295 }
 0x580   : > { %2230 = vmatmul.msk.f32.vlgmr.msrb.gmra.mxu2 %vm1157_vm14, %v1225_v30  ;;  %v1527_v30 = vld [vmem:[%s3466_s16 + $0x30] sm:$0xff] }
 0x586   : > { %v1369_v31 = vpop.xlane.xlu2 %1368 }
 0x587   : > { %2390 = vrcp.f32 %v1369_v31  ;;  %v1526_v31 = vld [vmem:[%s3466_s16 + $0x28] sm:$0xff] }
 0x588   : > { %2392 = vrcp.f32 %v1296_v32  ;;  %v1525_v32 = vld [vmem:[%s3466_s16 + $0x20] sm:$0xff] }
 0x589   : > { %2394 = vrcp.f32 %v1152_v36  ;;  %v1522_v36 = vld [vmem:[%s3466_s16 + $0x8] sm:$0xff] }
 0x58d   : > { %v2391_v33 = vpop.eup %2390 }
 0x58e   : > { %v1371_v34 = vmul.f32 %v2391_v33, %v2387_v25  ;;  %v1373_v35 = vpop.permute.xlu2 %1372  ;;  %v2393_v37 = vpop.eup %2392  ;;  %v1532_v25 = vld [vmem:[%s3466_s16 + $0x58] sm:$0xff] }
 0x58f   : > { %2237 = vmatpush.msk.msrb.mxu0 %vm1161_vm13, %v1373_v35  ;;  %v1298_v38 = vmul.f32 %v2393_v37, %v2385_v22  ;;  %v2395_v40 = vpop.eup %2394  ;;  %v1535_v22 = vld [vmem:[%s3466_s16 + $0x70] sm:$0xff]  ;;  %v1524_v33 = vld [vmem:[%s3466_s16 + $0x18] sm:$0xff] }
 0x590   : > { %2238 = vmatmul.msk.f32.vlgmr.msrb.gmra.mxu0 %vm1157_vm14, %v1371_v34  ;;  %v1154_v41 = vmul.f32 %v2395_v40, %v2383_v19  ;;  %1538 = vmatpush.msrb.mxu3 %v1535_v22  ;;  %v2364_v34 = vld [vmem:[%s3465_s15] ss:$0 sm:$0xff]  ;;  %v1523_v35 = vld [vmem:[%s3466_s16 + $0x10] sm:$0xff] }
 0x592   : > { %1539 = vmatpush.msrb.mxu3 %v1534_v23 }
 0x594   : > { %1540 = vmatpush.msrb.mxu3 %v1533_v24 }
 0x596   : > { %1541 = vmatpush.msrb.mxu3 %v1532_v25 }
 0x597   : > { %v1300_v39 = vpop.permute.xlu1 %1299 }
 0x598   : > { %2233 = vmatpush.msk.msra.mxu2 %vm1161_vm13, %v1300_v39  ;;  %1542 = vmatpush.msrb.mxu3 %v1531_v26  ;;  %v1521_v39 = vld [vmem:[%s3466_s16] sm:$0xff] }
 0x599   : > { %2234 = vmatmul.msk.f32.vlgmr.msra.gmra.mxu2 %vm1157_vm14, %v1298_v38 }
 0x59a   : > { %1493 = vmatpush.msrb.mxu2 %v1473_v2  ;;  %1543 = vmatpush.msrb.mxu3 %v1530_v27 }
 0x59c   : > { %1544 = vmatpush.msrb.mxu3 %v1529_v28 }
 0x59e   : > { %1545 = vmatpush.msrb.mxu3 %v1528_v29 }
 0x59f   : > { %v1156_v42 = vpop.permute.xlu1 %1155 }
 0x5a0   : > { %2225 = vmatpush.msk.msra.mxu1 %vm1161_vm13, %v1156_v42  ;;  %1546 = vmatpush.msrb.mxu3 %v1527_v30 }
 0x5a1   : > { %2226 = vmatmul.msk.f32.vlgmr.msra.gmra.mxu1 %vm1157_vm14, %v1154_v41 }
 0x5a2   : > { %1429 = vmatpush.msrb.mxu1 %v1409_v48  ;;  %1547 = vmatpush.msrb.mxu3 %v1526_v31 }
 0x5a4   : > { %1430 = vmatpush.msrb.mxu1 %v1408_v49  ;;  %1548 = vmatpush.msrb.mxu3 %v1525_v32 }
 0x5a6   : > { %1431 = vmatpush.msrb.mxu1 %v1407_v50  ;;  %1549 = vmatpush.msrb.mxu3 %v1524_v33 }
 0x5a8   : > { %1432 = vmatpush.msrb.mxu1 %v1406_v51  ;;  %1550 = vmatpush.msrb.mxu3 %v1523_v35 }
 0x5aa   : > { %1551 = vmatpush.msrb.mxu3 %v1522_v36 }
 0x5ac   : > { %1552 = vmatpush.msrb.mxu3 %v1521_v39 }
 0x603   : > { %v1250_v43 = vpop.f32.mrf.mxu2 }
 0x604   : > { %1254 = vrot.lane.b32.xlu2 %v1250_v43, %s3499_s1  ;;  %s3548_s1 = smov 96  }
 0x60d   : > { %v1396_v44 = vpop.f32.mrf.mxu0 }
 0x60e   : > { %1400 = vrot.lane.b32.xlu2 %v1396_v44, %s3501_s28  ;;  %s3552_s28 = smov 104  }
 0x61c   : > { %v1323_v45 = vpop.f32.mrf.mxu2 }
 0x61d   : > { %1327 = vrot.lane.b32.xlu1 %v1323_v45, %s3503_s30  ;;  %s3553_s30 = smov 112  }
 0x61e   : > { %v1181_v46 = vpop.f32.mrf.mxu1 }
 0x61f   : > { %1185 = vst.msk [vmem:[#allocation3] sm:$0x1f] %vm1184_vm15, %v1181_v46 }
 0x65e   : > { %v1255_v47 = vpop.permute.xlu2 %1254 }
 0x65f   : > { %1258 = vst.msk [vmem:[#allocation3] sm:$0x1f] %vm1257_vm1, %v1255_v47 }
 0x668   : > { %v1401_v53 = vpop.permute.xlu2 %1400 }
 0x68f   : > { %v1328_v52 = vpop.permute.xlu1 %1327 }
 0x690   : > { %1331 = vst.msk [vmem:[#allocation3] sm:$0x1f] %vm1330_vm3, %v1328_v52 }
 0x691   : > { %1404 = vst.msk [vmem:[#allocation3] sm:$0x1f] %vm1403_vm4, %v1401_v53 }
 0x698   : > { %v1405_v54 = vld [vmem:[#allocation3] sm:$0x1f] }
 0x699   : > { %2239 = vmatmul.msk.f32.vlgmr.msrb.gmra.mxu1 %vm1090_vm10, %v1405_v54 }
 0x716   : > { %v1434_v56 = vpop.f32.mrf.mxu1 }
 0x717   : > { %v1435_v57 = vadd.f32 %v2361_v55, %v1434_v56  ;;  %v2365_v55 = vld [vmem:[%s3467_s17] ss:$0 sm:$0xff] }
 0x719   : > { %v3115_v58 = vadd.f32 %v1435_v57, %v3012_v21  ;;  %v1472_v21 = vld [vmem:[%s3464_s14 + $0x10] sm:$0xff] }
 0x71a   : > { %1494 = vmatpush.msrb.mxu2 %v1472_v21  ;;  %v2246_v21 = vld [vmem:[%s3538_s4 + $0x38] sm:$0xff] }
 0x71b   : > { %v1440_v59 = vsel %vm1012_vm2, %v3115_v58, 0.0  ;;  %1622 = vmatpush.msra.mxu0 %v2246_v21 }
 0x71c   : > { %1441 = vadd.xlane.f32.xlu1 %v1440_v59  ;;  %1495 = vmatpush.msrb.mxu2 %v1471_v3  ;;  %v2244_v3 = vld [vmem:[%s3538_s4 + $0x28] sm:$0xff] }
 0x71e   : > { %1496 = vmatpush.msrb.mxu2 %v1470_v4  ;;  %v2243_v4 = vld [vmem:[%s3538_s4 + $0x20] sm:$0xff] }
 0x78f   : > { %v1442_v60 = vpop.xlane.xlu1 %1441 }
 0x790   : > { %v1443_v61 = vmul.f32 %v1442_v60, %v3001_v1 }
 0x792   : > { %v1444_v62 = vsub.f32 %v3115_v58, %v1443_v61 }
 0x794   : > { %v1445_v63 = vmul.f32 %v1444_v62, %v1444_v62 }
 0x796   : > { %v1446_v0 = vsel %vm1012_vm2, %v1445_v63, 0.0 }
 0x797   : > { %1447 = vadd.xlane.f32.xlu2 %v1446_v0 }
 0x80a   : > { %v1448_v5 = vpop.xlane.xlu2 %1447 }
 0x80b   : > { %v1449_v6 = vmul.f32 %v1448_v5, %v3001_v1 }
 0x80d   : > { %v1450_v7 = vadd.f32 1e-05, %v1449_v6 }
 0x80f   : > { %2396 = vrsqrt.f32 %v1450_v7  ;;  %vm1457_vm6 = vweird.f32 %v1450_v7 }
 0x815   : > { %v2397_v8 = vpop.eup %2396 }
 0x816   : > { %v1452_v9 = vmul.f32 %v2397_v8, %v1450_v7  ;;  %vm1458_vm5 = vweird.f32 %v2397_v8 }
 0x817   : > { %vm1459_vm7 = vmor %vm1457_vm6, %vm1458_vm5 }
 0x818   : > { %v1453_v10 = vmul.f32 %v2397_v8, %v1452_v9 }
 0x81a   : > { %v1454_v11 = vmul.f32 0.5, %v1453_v10 }
 0x81c   : > { %v1455_v12 = vsub.f32 1.5, %v1454_v11 }
 0x81e   : > { %v1456_v13 = vmul.f32 %v2397_v8, %v1455_v12 }
 0x820   : > { %v1460_v15 = vsel %vm1459_vm7, %v2397_v8, %v1456_v13 }
 0x821   : > { %v1461_v16 = vmul.f32 %v1460_v15, %v1444_v62 }
 0x823   : > { %v1465_v18 = vmul.f32 %v2362_v14, %v1461_v16  ;;  %v2366_v14 = vld [vmem:[%s3540_s3 + $0x1] ss:$0 sm:$0xff] }
 0x825   : > { %v1469_v19 = vadd.f32 %v2363_v17, %v1465_v18  ;;  %v2367_v17 = vld [vmem:[%s3541_s25 + $0x1] ss:$0 sm:$0xff] }
 0x827   : > { %2240 = vmatmul.msk.f32.vlgmr.msrb.gmra.mxu2 %vm1090_vm10, %v1469_v19 }
 0x8aa   : > { %v1498_v37 = vpop.f32.mrf.mxu2 }
 0x8ab   : > { %v1499_v38 = vadd.f32 %v2364_v34, %v1498_v37 }
 0x8ad   : > { %v1501_v40 = vmul.f32 -1.702, %v1499_v38 }
 0x8af   : > { %v1502_v41 = vmul.f32 1.442695, %v1501_v40 }
 0x8b1   : > { %2398 = vpow2.f32 %v1502_v41 }
 0x8b7   : > { %v2399_v42 = vpop.eup %2398 }
 0x8b8   : > { %v1504_v43 = vadd.f32 1.0, %v2399_v42 }
 0x8ba   : > { %2400 = vrcp.f32 %v1504_v43  ;;  %v1516_v47 = vand.u32 2147483648, %v1504_v43  ;;  %v1514_v49 = vand.u32 2147483647, %v1504_v43  ;;  %vm1510_vm9 = vweird.f32 %v1504_v43 }
 0x8bc   : > { %v1517_v51 = vor.u32 1.1754944e-38, %v1516_v47  ;;  %vm1515_vm6 = vcmp.eq.f32.partialorder %v1514_v49, 8.507059e+37 }
 0x8c0   : > { %v2401_v44 = vpop.eup %2400 }
 0x8c1   : > { %v1506_v45 = vmul.f32 %v2401_v44, %v1504_v43  ;;  %vm1511_vm8 = vweird.f32 %v2401_v44 }
 0x8c2   : > { %vm1512_vm5 = vmor %vm1510_vm9, %vm1511_vm8 }
 0x8c3   : > { %v1507_v46 = vsub.f32 1.0, %v1506_v45 }
 0x8c5   : > { %v1508_v48 = vmul.f32 %v2401_v44, %v1507_v46 }
 0x8c7   : > { %v1509_v50 = vadd.f32 %v2401_v44, %v1508_v48 }
 0x8c9   : > { %v1513_v52 = vsel %vm1512_vm5, %v2401_v44, %v1509_v50 }
 0x8ca   : > { %v1518_v53 = vsel %vm1515_vm6, %v1517_v51, %v1513_v52 }
 0x8cb   : > { %v1520_v54 = vmul.f32 %v1518_v53, %v1499_v38 }
 0x8cd   : > { %1553 = vmatmul.f32.vlgmr.msrb.gmra.mxu3 %v1520_v54 }
 0x950   : > { %v1554_v56 = vpop.f32.mrf.mxu3 }
 0x951   : > { %v1557_v57 = vadd.f32 %v1554_v56, %v3115_v58  ;;  %v2245_v58 = vld [vmem:[%s3538_s4 + $0x30] sm:$0xff] }
 0x952   : > { %1623 = vmatpush.msra.mxu0 %v2245_v58 }
 0x953   : > { %v3197_v59 = vadd.f32 %v2365_v55, %v1557_v57 }
 0x954   : > { %1624 = vmatpush.msra.mxu0 %v2244_v3 }
 0x955   : > { %v1567_v60 = vsel %vm1012_vm2, %v3197_v59, 0.0 }
 0x956   : > { %1568 = vadd.xlane.f32.xlu0 %v1567_v60  ;;  %1625 = vmatpush.msra.mxu0 %v2243_v4 }
 0x9c9   : > { %v1569_v61 = vpop.xlane.xlu0 %1568 }
 0x9ca   : > { %v1570_v62 = vmul.f32 %v1569_v61, %v3001_v1 }
 0x9cc   : > { %v1571_v63 = vsub.f32 %v3197_v59, %v1570_v62 }
 0x9ce   : > { %v1572_v0 = vmul.f32 %v1571_v63, %v1571_v63 }
 0x9d0   : > { %v1573_v2 = vsel %vm1012_vm2, %v1572_v0, 0.0 }
 0x9d1   : > { %1574 = vadd.xlane.f32.xlu0 %v1573_v2 }
 0xa44   : > { %v1575_v5 = vpop.xlane.xlu0 %1574 }
 0xa45   : > { %v1576_v6 = vmul.f32 %v1575_v5, %v3001_v1 }
 0xa47   : > { %v1577_v7 = vadd.f32 1e-05, %v1576_v6 }
 0xa49   : > { %2402 = vrsqrt.f32 %v1577_v7  ;;  %vm1584_vm8 = vweird.f32 %v1577_v7 }
 0xa4f   : > { %v2403_v8 = vpop.eup %2402 }
 0xa50   : > { %v1579_v9 = vmul.f32 %v2403_v8, %v1577_v7  ;;  %vm1585_vm7 = vweird.f32 %v2403_v8 }
 0xa51   : > { %vm1586_vm9 = vmor %vm1584_vm8, %vm1585_vm7 }
 0xa52   : > { %v1580_v10 = vmul.f32 %v2403_v8, %v1579_v9 }
 0xa54   : > { %v1581_v11 = vmul.f32 0.5, %v1580_v10 }
 0xa56   : > { %v1582_v12 = vsub.f32 1.5, %v1581_v11 }
 0xa58   : > { %v1583_v13 = vmul.f32 %v2403_v8, %v1582_v12 }
 0xa5a   : > { %v1587_v15 = vsel %vm1586_vm9, %v2403_v8, %v1583_v13 }
 0xa5b   : > { %v1588_v16 = vmul.f32 %v1587_v15, %v1571_v63 }
 0xa5d   : > { %v1592_v18 = vmul.f32 %v2366_v14, %v1588_v16 }
 0xa5f   : > { %v1596_v19 = vadd.f32 %v2367_v17, %v1592_v18 }
 0xa61   : > { %2248 = vmatmul.msk.f32.vlgmr.msra.gmra.mxu0 %vm1090_vm10, %v1596_v19 }
 0xade   : > { %v1627_v22 = vpop.f32.mrf.mxu0 }
 0xadf   : > { %v3227_v23 = vadd.f32 %v2368_v20, %v1627_v22  ;;  %v2268_v22 = vld [vmem:[%s3543_s10 + $0x38] sm:$0xff] }
 0xae1   : > { %1697 = vrot.lane.b32.xlu2 %v3227_v23, %s3546_s5  ;;  %1699 = vrot.lane.b32.xlu1 %v3227_v23, %s3547_s6  ;;  %s3556_s5 = smov 48   ;;  %s3557_s6 = smov 8  }
 0xae2   : > { %1631 = vrot.lane.b32.xlu0 %v3227_v23, %s3548_s1  ;;  %s3558_s1 = smov 16  }
 0xb3b   : > { %v1698_v26 = vpop.permute.xlu2 %1697 }
 0xb53   : > { %v1700_v24 = vpop.permute.xlu1 %1699 }
 0xb54   : > { %v1632_v25 = vpop.permute.xlu0 %1631  ;;  %2253 = vmatpush.xpose.msk.msrb.mxu0 %vm1117_vm11, %v1700_v24  ;;  %v2266_v24 = vld [vmem:[%s3543_s10 + $0x28] sm:$0xff] }
 0xb55   : > { %2249 = vmatpush.xpose.msk.msra.mxu1 %vm1117_vm11, %v1632_v25  ;;  %v2265_v25 = vld [vmem:[%s3543_s10 + $0x20] sm:$0xff] }
 0xb57   : > { %2254 = vmatmul.msk.f32.vlgmr.msrb.gmra.mxu0 %vm1117_vm11, %v1698_v26 }
 0xb58   : > { %2250 = vmatmul.msk.f32.vlgmr.msra.gmra.mxu1 %vm1117_vm11, %v3227_v23 }
 0xbd4   : > { %v1722_v27 = vpop.f32.mrf.mxu0 }
 0xbd5   : > { %v1654_v28 = vpop.f32.mrf.mxu1  ;;  %v1725_v29 = vmul.f32 0.35355338, %v1722_v27 }
 0xbd6   : > { %v1657_v30 = vmul.f32 0.35355338, %v1654_v28 }
 0xbd7   : > { %v1726_v31 = vsel %vm1143_vm12, %v1725_v29, -inf }
 0xbd8   : > { %1727 = vmax.xlane.f32.xlu1 %v1726_v31  ;;  %v1658_v32 = vsel %vm1143_vm12, %v1657_v30, -inf }
 0xbd9   : > { %1659 = vmax.xlane.f32.xlu0 %v1658_v32 }
 0xbed   : > { %1669 = vrot.lane.b32.xlu0 %v3227_v23, %s3549_s26  ;;  %s3559_s26 = smov 24  }
 0xbf1   : > { %1737 = vrot.lane.b32.xlu1 %v3227_v23, %s3550_s8  ;;  %s2507_s8 = smov 32  }
 0xbf5   : > { %1843 = vrot.lane.b32.xlu0 %v3227_v23, %s3551_s29 }
 0xbf9   : > { %1841 = vrot.lane.b32.xlu1 %v3227_v23, %s3552_s28  ;;  %s755_s28 = sand.u32 1, %s2482_s2  }
 0xc4b   : > { %v1728_v33 = vpop.xlane.xlu1 %1727 }
 0xc4c   : > { %v1729_v34 = vsub.f32 %v1725_v29, %v1728_v33  ;;  %v1660_v35 = vpop.xlane.xlu0 %1659  ;;  %v2369_v29 = vld [vmem:[%s3544_s11 + $0x1] ss:$0 sm:$0xff] }
 0xc4d   : > { %v1661_v36 = vsub.f32 %v1657_v30, %v1660_v35 }
 0xc4e   : > { %v1730_v37 = vmul.f32 1.442695, %v1729_v34 }
 0xc4f   : > { %v1662_v38 = vmul.f32 1.442695, %v1661_v36 }
 0xc50   : > { %2404 = vpow2.f32 %v1730_v37 }
 0xc51   : > { %2406 = vpow2.f32 %v1662_v38 }
 0xc56   : > { %v2405_v39 = vpop.eup %2404 }
 0xc57   : > { %v2407_v40 = vpop.eup %2406  ;;  %v1732_v41 = vsel %vm1143_vm12, %v2405_v39, 0.0 }
 0xc58   : > { %1733 = vadd.xlane.f32.xlu0 %v1732_v41  ;;  %v1664_v42 = vsel %vm1143_vm12, %v2407_v40, 0.0  ;;  %v2273_v41 = vld [vmem:[%s3464_s14 + $0x20] sm:$0xff] }
 0xc59   : > { %1665 = vadd.xlane.f32.xlu2 %v1664_v42 }
 0xc5f   : > { %v1670_v43 = vpop.permute.xlu0 %1669 }
 0xc60   : > { %2251 = vmatpush.msk.msra.mxu2 %vm1161_vm13, %v1670_v43 }
 0xc63   : > { %v1738_v44 = vpop.permute.xlu1 %1737 }
 0xc64   : > { %2255 = vmatpush.msk.msrb.mxu1 %vm1161_vm13, %v1738_v44 }
 0xc67   : > { %v1844_v45 = vpop.permute.xlu0 %1843 }
 0xc68   : > { %2261 = vmatpush.xpose.msk.msra.mxu1 %vm1117_vm11, %v1844_v45 }
 0xc6b   : > { %v1842_v53 = vpop.permute.xlu1 %1841 }
 0xc6c   : > { %1769 = vrot.lane.b32.xlu0 %v3227_v23, %s3553_s30 }
 0xc71   : > { %1771 = vrot.lane.b32.xlu2 %v3227_v23, %s3554_s0  ;;  %s3560_s0 = sld [smem:[#allocation27_spill]] }
 0xc77   : > { %s2158_s3 = scalar_lea.hbm %s3560_s0, %s2660_s7 }
 0xc78   : > { %s2162_s11 = sshll.u32 %s2158_s3, 4  ;;  %s2448_s3 = scalar_lea.hbm %s3560_s0, 2  ;;  %s2163_s11 = int_to_ptr.hbm [resolvable:$true] %s2162_s11 }
 0xccb   : > { %v1734_v46 = vpop.xlane.xlu0 %1733 }
 0xccc   : > { %v1666_v47 = vpop.xlane.xlu2 %1665  ;;  %2408 = vrcp.f32 %v1734_v46 }
 0xccd   : > { %2410 = vrcp.f32 %v1666_v47 }
 0xcd2   : > { %v2409_v48 = vpop.eup %2408 }
 0xcd3   : > { %v2411_v49 = vpop.eup %2410  ;;  %v1736_v50 = vmul.f32 %v2409_v48, %v2405_v39  ;;  %v2276_v39 = vld [vmem:[%s3464_s14 + $0x38] sm:$0xff] }
 0xcd4   : > { %v1668_v51 = vmul.f32 %v2411_v49, %v2407_v40  ;;  %v1772_v52 = vpop.permute.xlu2 %1771  ;;  %v2274_v40 = vld [vmem:[%s3464_s14 + $0x28] sm:$0xff] }
 0xcd5   : > { %2257 = vmatpush.xpose.msk.msrb.mxu2 %vm1117_vm11, %v1772_v52  ;;  %2256 = vmatmul.msk.f32.vlgmr.msrb.gmra.mxu1 %vm1157_vm14, %v1736_v50 }
 0xcd6   : > { %2252 = vmatmul.msk.f32.vlgmr.msra.gmra.mxu2 %vm1157_vm14, %v1668_v51  ;;  %2007 = vmatpush.msrb.mxu1 %v2276_v39  ;;  %v2370_v51 = vld [vmem:[%s3545_s12 + $0x1] ss:$0 sm:$0xff] }
 0xcdd   : > { %2262 = vmatmul.msk.f32.vlgmr.msra.gmra.mxu1 %vm1117_vm11, %v1842_v53 }
 0xcde   : > { %v1770_v54 = vpop.permute.xlu0 %1769 }
 0xcdf   : > { %2258 = vmatmul.msk.f32.vlgmr.msrb.gmra.mxu2 %vm1117_vm11, %v1770_v54  ;;  %v2371_v54 = vld [vmem:[%s3463_s13 + $0x1] ss:$0 sm:$0xff] }
 0xd52   : > { %v1761_v55 = vpop.f32.mrf.mxu1 }
 0xd59   : > { %v1693_v56 = vpop.f32.mrf.mxu2 }
 0xd5a   : > { %1696 = vst.msk [vmem:[#allocation3] sm:$0x1f] %vm1184_vm15, %v1693_v56  ;;  %v1866_v57 = vpop.f32.mrf.mxu1 }
 0xd5b   : > { %v1869_v60 = vmul.f32 0.35355338, %v1866_v57  ;;  %v2294_v57 = vld [vmem:[%s3466_s16 + $0xf8] sm:$0xff] }
 0xd5d   : > { %v1870_v61 = vsel %vm1143_vm12, %v1869_v60, -inf }
 0xd5e   : > { %1871 = vmax.xlane.f32.xlu2 %v1870_v61  ;;  %v2292_v61 = vld [vmem:[%s3466_s16 + $0xe8] sm:$0xff] }
 0xd62   : > { %v1794_v62 = vpop.f32.mrf.mxu2 }
 0xd63   : > { %v1797_v63 = vmul.f32 0.35355338, %v1794_v62  ;;  %v2291_v62 = vld [vmem:[%s3466_s16 + $0xe0] sm:$0xff] }
 0xd65   : > { %v1798_v0 = vsel %vm1143_vm12, %v1797_v63, -inf }
 0xd66   : > { %1799 = vmax.xlane.f32.xlu0 %v1798_v0  ;;  %v2289_v0 = vld [vmem:[%s3466_s16 + $0xd0] sm:$0xff] }
 0xd7a   : > { %1881 = vrot.lane.b32.xlu0 %v3227_v23, %s3555_s9  ;;  %s756_s9 = scalar_lea.vmem [#allocation4], %s755_s28 }
 0xdd1   : > { %v1872_v2 = vpop.xlane.xlu2 %1871 }
 0xdd2   : > { %v1873_v21 = vsub.f32 %v1869_v60, %v1872_v2  ;;  %v2293_v60 = vld [vmem:[%s3466_s16 + $0xf0] sm:$0xff]  ;;  %v2288_v2 = vld [vmem:[%s3466_s16 + $0xc8] sm:$0xff] }
 0xdd4   : > { %v1874_v58 = vmul.f32 1.442695, %v1873_v21  ;;  %v2287_v21 = vld [vmem:[%s3466_s16 + $0xc0] sm:$0xff] }
 0xdd6   : > { %2412 = vpow2.f32 %v1874_v58  ;;  %v2286_v58 = vld [vmem:[%s3466_s16 + $0xb8] sm:$0xff] }
 0xdd9   : > { %v1800_v3 = vpop.xlane.xlu0 %1799 }
 0xdda   : > { %v1801_v4 = vsub.f32 %v1797_v63, %v1800_v3  ;;  %v2290_v63 = vld [vmem:[%s3466_s16 + $0xd8] sm:$0xff]  ;;  %v2285_v3 = vld [vmem:[%s3466_s16 + $0xb0] sm:$0xff] }
 0xddc   : > { %v2413_v5 = vpop.eup %2412  ;;  %v1802_v6 = vmul.f32 1.442695, %v1801_v4  ;;  %v2284_v4 = vld [vmem:[%s3466_s16 + $0xa8] sm:$0xff] }
 0xddd   : > { %v1876_v7 = vsel %vm1143_vm12, %v2413_v5, 0.0 }
 0xdde   : > { %2414 = vpow2.f32 %v1802_v6  ;;  %1877 = vadd.xlane.f32.xlu1 %v1876_v7  ;;  %v2282_v6 = vld [vmem:[%s3466_s16 + $0x98] sm:$0xff]  ;;  %v2372_v7 = vld [vmem:[%s3465_s15 + $0x1] ss:$0 sm:$0xff] }
 0xde4   : > { %v2415_v8 = vpop.eup %2414 }
 0xde5   : > { %v1804_v9 = vsel %vm1143_vm12, %v2415_v8, 0.0 }
 0xde6   : > { %1805 = vadd.xlane.f32.xlu2 %v1804_v9 }
 0xdec   : > { %v1882_v10 = vpop.permute.xlu0 %1881 }
 0xded   : > { %2263 = vmatpush.msk.msra.mxu2 %vm1161_vm13, %v1882_v10  ;;  %v2280_v10 = vld [vmem:[%s3466_s16 + $0x88] sm:$0xff] }
 0xdef   : > { %2052 = vmatpush.msrb.mxu2 %v2294_v57  ;;  %v2134_v57 = vld [vmem:[%s3472_s22] sm:$0x1] }
 0xdf1   : > { %2053 = vmatpush.msrb.mxu2 %v2293_v60 }
 0xdf3   : > { %2054 = vmatpush.msrb.mxu2 %v2292_v61 }
 0xdf5   : > { %2055 = vmatpush.msrb.mxu2 %v2291_v62  ;;  %v2136_v62 = vld [vmem:[%s3473_s23] sm:$0x1] }
 0xdf7   : > { %1809 = vrot.lane.b32.xlu1 %v3227_v23, %s3556_s5  ;;  %v2267_v23 = vld [vmem:[%s3543_s10 + $0x30] sm:$0xff]  ;;  %2056 = vmatpush.msrb.mxu2 %v2290_v63  ;;  %s2160_s10 = sshll.u32 %s756_s9, 4  ;;  %s2150_s5 = scalar_lea.sflag [#allocation5], %s755_s28  ;;  %s2161_s10 = int_to_ptr.vmem [resolvable:$true] %s2160_s10 }
 0xdf9   : > { %2057 = vmatpush.msrb.mxu2 %v2289_v0  ;;  %v2138_v0 = vld [vmem:[%s3474_s24] sm:$0x1] }
 0xdfb   : > { %2058 = vmatpush.msrb.mxu2 %v2288_v2 }
 0xdfd   : > { %2059 = vmatpush.msrb.mxu2 %v2287_v21 }
 0xdfe   : > { %1765 = vrot.lane.b32.xlu2 %v1761_v55, %s3557_s6  ;;  %s2442_s6 = sshra.s32 %s2163_s11, 4  ;;  %s2443_s6 = int_to_ptr.hbm [resolvable:$true] %s2442_s6 }
 0xdff   : > { %2060 = vmatpush.msrb.mxu2 %v2286_v58  ;;  %p2449_p0 = scmp.lt.s32.totalorder %s2443_s6, %s3560_s0 }
 0xe01   : > { %2061 = vmatpush.msrb.mxu2 %v2285_v3  ;;  %v2508_v3 = vmov 0.0  }
 0xe03   : > { %2062 = vmatpush.msrb.mxu2 %v2284_v4 }
 0xe51   : > { %v1878_v11 = vpop.xlane.xlu1 %1877 }
 0xe52   : > { %2416 = vrcp.f32 %v1878_v11 }
 0xe58   : > { %v2417_v12 = vpop.eup %2416 }
 0xe59   : > { %v1880_v13 = vmul.f32 %v2417_v12, %v2413_v5  ;;  %v1806_v14 = vpop.xlane.xlu2 %1805  ;;  %v2283_v5 = vld [vmem:[%s3466_s16 + $0xa0] sm:$0xff] }
 0xe5a   : > { %2418 = vrcp.f32 %v1806_v14  ;;  %2063 = vmatpush.msrb.mxu2 %v2283_v5  ;;  %v2279_v12 = vld [vmem:[%s3466_s16 + $0x80] sm:$0xff] }
 0xe5b   : > { %2264 = vmatmul.msk.f32.vlgmr.msra.gmra.mxu2 %vm1157_vm14, %v1880_v13 }
 0xe5c   : > { %2064 = vmatpush.msrb.mxu2 %v2282_v6 }
 0xe60   : > { %v2419_v16 = vpop.eup %2418 }
 0xe61   : > { %v1766_v15 = vpop.permute.xlu2 %1765  ;;  %v1808_v17 = vmul.f32 %v2419_v16, %v2415_v8  ;;  %v2281_v8 = vld [vmem:[%s3466_s16 + $0x90] sm:$0xff] }
 0xe62   : > { %1768 = vst.msk [vmem:[#allocation3] sm:$0x1f] %vm1257_vm1, %v1766_v15  ;;  %2065 = vmatpush.msrb.mxu2 %v2281_v8 }
 0xe64   : > { %2066 = vmatpush.msrb.mxu2 %v2280_v10 }
 0xe66   : > { %2067 = vmatpush.msrb.mxu2 %v2279_v12 }
 0xe69   : > { %v1810_v18 = vpop.permute.xlu1 %1809 }
 0xe6a   : > { %2259 = vmatpush.msk.msra.mxu0 %vm1161_vm13, %v1810_v18 }
 0xe6b   : > { %2260 = vmatmul.msk.f32.vlgmr.msra.gmra.mxu0 %vm1157_vm14, %v1808_v17 }
 0xe6c   : > { %1939 = vmatpush.msrb.mxu0 %v2268_v22 }
 0xe6e   : > { %1940 = vmatpush.msrb.mxu0 %v2267_v23 }
 0xe70   : > { %1941 = vmatpush.msrb.mxu0 %v2266_v24 }
 0xe72   : > { %1942 = vmatpush.msrb.mxu0 %v2265_v25 }
 0xede   : > { %v1905_v20 = vpop.f32.mrf.mxu2 }
 0xee8   : > { %v1833_v19 = vpop.f32.mrf.mxu0 }
 0xee9   : > { %1837 = vrot.lane.b32.xlu0 %v1833_v19, %s3558_s1  ;;  %s2444_s1 = scalar_lea.hbm %s2443_s6, 1 }
 0xeea   : > { %p2445_p11 = scmp.ne.s32.totalorder %s2443_s6, %s2444_s1  ;;  %p2450_p1 = scmp.lt.s32.totalorder %s2448_s3, %s2444_s1 }
 0xeec   : > { %p2446_p12 = pnand %p2445_p11, %p2677_p5  ;;  %p2451_p2 = por %p2450_p1, %p2449_p0 }
 0xeee   : > { %p2447_p13 = pneg %p2446_p12 }
 0xef0   : > { %p2452_p3 = pnand %p2451_p2, %p2447_p13 }
 0xef1   : > { %1909 = vrot.lane.b32.xlu0 %v1905_v20, %s3559_s26 }
 0xf5b   : > { %v1838_v26 = vpop.permute.xlu0 %1837 }
 0xf5c   : > { %1840 = vst.msk [vmem:[#allocation3] sm:$0x1f] %vm1330_vm3, %v1838_v26 }
 0xf63   : > { %v1910_v27 = vpop.permute.xlu0 %1909 }
 0xf64   : > { %1912 = vst.msk [vmem:[#allocation3] sm:$0x1f] %vm1403_vm4, %v1910_v27 }
 0xf6b   : > { %v1913_v28 = vld [vmem:[#allocation3] sm:$0x1f] }
 0xf6c   : > { %2270 = vmatmul.msk.f32.vlgmr.msrb.gmra.mxu0 %vm1090_vm10, %v1913_v28 }
 0xfe9   : > { %v1944_v30 = vpop.f32.mrf.mxu0 }
 0xfea   : > { %v1945_v31 = vadd.f32 %v2369_v29, %v1944_v30  ;;  %v2373_v29 = vld [vmem:[%s3467_s17 + $0x1] ss:$0 sm:$0xff] }
 0xfec   : > { %v3300_v32 = vadd.f32 %v1945_v31, %v3197_v59  ;;  %v2275_v59 = vld [vmem:[%s3464_s14 + $0x30] sm:$0xff] }
 0xfed   : > { %2008 = vmatpush.msrb.mxu1 %v2275_v59  ;;  %v2108_v59 = vld [vmem:[%s3470_s20 + $0x18] sm:$0xff] }
 0xfee   : > { %v1952_v33 = vsel %vm1012_vm2, %v3300_v32, 0.0  ;;  %2124 = vmatpush.msra.mxu3 %v2108_v59 }
 0xfef   : > { %1953 = vadd.xlane.f32.xlu2 %v1952_v33  ;;  %2009 = vmatpush.msrb.mxu1 %v2274_v40  ;;  %v2106_v40 = vld [vmem:[%s3470_s20 + $0x8] sm:$0xff] }
 0xff1   : > { %2010 = vmatpush.msrb.mxu1 %v2273_v41  ;;  %v2105_v41 = vld [vmem:[%s3470_s20] sm:$0xff] }
0x1062   : > { %v1954_v34 = vpop.xlane.xlu2 %1953 }
0x1063   : > { %v1955_v35 = vmul.f32 %v1954_v34, %v3001_v1 }
0x1065   : > { %v1956_v36 = vsub.f32 %v3300_v32, %v1955_v35 }
0x1067   : > { %v1957_v37 = vmul.f32 %v1956_v36, %v1956_v36 }
0x1069   : > { %v1958_v38 = vsel %vm1012_vm2, %v1957_v37, 0.0 }
0x106a   : > { %1959 = vadd.xlane.f32.xlu1 %v1958_v38 }
0x10dd   : > { %v1960_v42 = vpop.xlane.xlu1 %1959 }
0x10de   : > { %v1961_v43 = vmul.f32 %v1960_v42, %v3001_v1 }
0x10e0   : > { %v1962_v44 = vadd.f32 1e-05, %v1961_v43 }
0x10e2   : > { %2420 = vrsqrt.f32 %v1962_v44  ;;  %vm1969_vm11 = vweird.f32 %v1962_v44 }
0x10e8   : > { %v2421_v45 = vpop.eup %2420 }
0x10e9   : > { %v1964_v46 = vmul.f32 %v2421_v45, %v1962_v44  ;;  %vm1970_vm2 = vweird.f32 %v2421_v45 }
0x10ea   : > { %vm1971_vm12 = vmor %vm1969_vm11, %vm1970_vm2 }
0x10eb   : > { %v1965_v47 = vmul.f32 %v2421_v45, %v1964_v46 }
0x10ed   : > { %v1966_v48 = vmul.f32 0.5, %v1965_v47 }
0x10ef   : > { %v1967_v49 = vsub.f32 1.5, %v1966_v48 }
0x10f1   : > { %v1968_v50 = vmul.f32 %v2421_v45, %v1967_v49 }
0x10f3   : > { %v1972_v52 = vsel %vm1971_vm12, %v2421_v45, %v1968_v50 }
0x10f4   : > { %v1973_v53 = vmul.f32 %v1972_v52, %v1956_v36 }
0x10f6   : > { %v1977_v55 = vmul.f32 %v2370_v51, %v1973_v53  ;;  %v2079_v51 = vld [vmem:[%s3468_s18] sm:$0x1] }
0x10f8   : > { %v1981_v56 = vadd.f32 %v2371_v54, %v1977_v55  ;;  %v2132_v55 = vld [vmem:[%s3471_s21] sm:$0x1] }
0x10fa   : > { %2278 = vmatmul.msk.f32.vlgmr.msrb.gmra.mxu1 %vm1090_vm10, %v1981_v56 }
0x1177   : > { %v2012_v9 = vpop.f32.mrf.mxu1 }
0x1178   : > { %v2013_v11 = vadd.f32 %v2372_v7, %v2012_v9 }
0x117a   : > { %v2015_v13 = vmul.f32 -1.702, %v2013_v11 }
0x117c   : > { %v2016_v14 = vmul.f32 1.442695, %v2015_v13 }
0x117e   : > { %2422 = vpow2.f32 %v2016_v14 }
0x1184   : > { %v2423_v15 = vpop.eup %2422 }
0x1185   : > { %v2018_v16 = vadd.f32 1.0, %v2423_v15 }
0x1187   : > { %2424 = vrcp.f32 %v2018_v16  ;;  %v2030_v20 = vand.u32 2147483648, %v2018_v16  ;;  %v2028_v23 = vand.u32 2147483647, %v2018_v16  ;;  %vm2024_vm14 = vweird.f32 %v2018_v16 }
0x1189   : > { %v2031_v25 = vor.u32 1.1754944e-38, %v2030_v20  ;;  %vm2029_vm1 = vcmp.eq.f32.partialorder %v2028_v23, 8.507059e+37 }
0x118d   : > { %v2425_v17 = vpop.eup %2424 }
0x118e   : > { %v2020_v18 = vmul.f32 %v2425_v17, %v2018_v16  ;;  %vm2025_vm13 = vweird.f32 %v2425_v17 }
0x118f   : > { %vm2026_vm15 = vmor %vm2024_vm14, %vm2025_vm13 }
0x1190   : > { %v2021_v19 = vsub.f32 1.0, %v2020_v18 }
0x1192   : > { %v2022_v22 = vmul.f32 %v2425_v17, %v2021_v19 }
0x1194   : > { %v2023_v24 = vadd.f32 %v2425_v17, %v2022_v22 }
0x1196   : > { %v2027_v26 = vsel %vm2026_vm15, %v2425_v17, %v2023_v24 }
0x1197   : > { %v2032_v27 = vsel %vm2029_vm1, %v2031_v25, %v2027_v26 }
0x1198   : > { %v2034_v28 = vmul.f32 %v2032_v27, %v2013_v11 }
0x119a   : > { %2068 = vmatmul.f32.vlgmr.msrb.gmra.mxu2 %v2034_v28 }
0x121d   : > { %v2069_v30 = vpop.f32.mrf.mxu2 }
0x121e   : > { %v2072_v31 = vadd.f32 %v2069_v30, %v3300_v32  ;;  %v2107_v32 = vld [vmem:[%s3470_s20 + $0x10] sm:$0xff] }
0x121f   : > { %2125 = vmatpush.msra.mxu3 %v2107_v32 }
0x1220   : > { %v2078_v33 = vadd.f32 %v2373_v29, %v2072_v31 }
0x1221   : > { %2126 = vmatpush.msra.mxu3 %v2106_v40 }
0x1222   : > { %v2081_v34 = vsel %vm864_vm0, %v2078_v33, 0.0 }
0x1223   : > { %2082 = vadd.xlane.f32.xlu0 %v2081_v34  ;;  %2127 = vmatpush.msra.mxu3 %v2105_v41 }
0x1296   : > { %v2083_v35 = vpop.xlane.xlu0 %2082 }
0x1297   : > { %v2084_v36 = vmul.f32 %v2083_v35, %v3001_v1 }
0x1299   : > { %v2085_v37 = vsub.f32 %v2078_v33, %v2084_v36 }
0x129b   : > { %v2086_v38 = vmul.f32 %v2085_v37, %v2085_v37 }
0x129d   : > { %v2087_v39 = vsel %vm864_vm0, %v2086_v38, 0.0 }
0x129e   : > { %2088 = vadd.xlane.f32.xlu2 %v2087_v39 }
0x1311   : > { %v2089_v42 = vpop.xlane.xlu2 %2088 }
0x1312   : > { %v2090_v43 = vmul.f32 %v2089_v42, %v3001_v1  ;;  %v2080_v1 = vld [vmem:[%s3469_s19] sm:$0x1] }
0x1314   : > { %v2091_v44 = vadd.f32 1e-05, %v2090_v43 }
0x1316   : > { %2426 = vrsqrt.f32 %v2091_v44  ;;  %vm2098_vm4 = vweird.f32 %v2091_v44 }
0x131c   : > { %v2427_v45 = vpop.eup %2426 }
0x131d   : > { %v2093_v46 = vmul.f32 %v2427_v45, %v2091_v44  ;;  %vm2099_vm3 = vweird.f32 %v2427_v45 }
0x131e   : > { %vm2100_vm5 = vmor %vm2098_vm4, %vm2099_vm3 }
0x131f   : > { %v2094_v47 = vmul.f32 %v2427_v45, %v2093_v46 }
0x1321   : > { %v2095_v48 = vmul.f32 0.5, %v2094_v47 }
0x1323   : > { %v2096_v49 = vsub.f32 1.5, %v2095_v48 }
0x1325   : > { %v2097_v50 = vmul.f32 %v2427_v45, %v2096_v49 }
0x1327   : > { %v2101_v52 = vsel %vm2100_vm5, %v2427_v45, %v2097_v50 }
0x1328   : > { %v2102_v53 = vmul.f32 %v2101_v52, %v2085_v37 }
0x132a   : > { %v2103_v54 = vmul.f32 %v2102_v53, %v2079_v51 }
0x132c   : > { %v2104_v56 = vadd.f32 %v2103_v54, %v2080_v1 }
0x132e   : > { %2296 = vmatmul.msk.f32.vlgmr.msra.gmra.mxu3 %vm1090_vm10, %v2104_v56  ;;  %v2133_v60 = vmul.f32 %v2132_v55, %v2104_v56  ;;  %vm2147_vm10 = vcmask 1040768  }
0x1330   : > { %v2135_v61 = vadd.f32 %v2134_v57, %v2133_v60 }
0x1332   : > { %2140 = vst.msk [vmem:[%s756_s9] sm:$0x1] %vm864_vm0, %v2135_v61  ;;  %vm2145_vm0 = vcmask 385280  }
0x13b1   : > { %v2129_v63 = vpop.f32.mrf.mxu3 }
0x13b2   : > { %v2137_v2 = vmul.f32 %v2136_v62, %v2129_v63 }
0x13b4   : > { %v2139_v21 = vadd.f32 %v2138_v0, %v2137_v2 }
0x13b6   : > { %2142 = vrot.lane.b32.xlu1 %v2139_v21, %s2507_s8 }
0x1428   : > { %v2143_v58 = vpop.permute.xlu1 %2142 }
0x1429   : > { %2146 = vst.msk [vmem:[%s756_s9] sm:$0x1] %vm2145_vm0, %v2143_v58 }
0x142a   : > { %2148 = vst.msk [vmem:[%s756_s9] sm:$0x1] %vm2147_vm10, %v2508_v3 }
0x142b   : > { %2455 = shalt.err (!%p2452_p3)
}
0x142c   : > { %2300 = dma.vmem_to_hbm [thread:$0]  (%p2677_p5), %s2161_s10, 16, %s2163_s11, %s2150_s5  }
0x142d PF: > { %s3562_s28 = sld [smem:[#allocation9_spill]] }
0x142e   : > { %s3563_s9 = sld [smem:[#allocation7_spill]] }
0x1433   : > { %p2306_p4 = scmp.ge.s32.totalorder %s3562_s28, 2 }
0x1434   : > { %s2174_s12 = sand.u32 1, %s3563_s9  }
0x1435   : > { %p2303_p7 = pnand %p2306_p4, %p2681_p6  ;;  %s2175_s7 = scalar_lea.sflag [#allocation5], %s2174_s12 }
0x1437   : > { %p2304_p8 = pneg %p2303_p7 }
0x1439   : > { %2473 = dma.done.wait (%p2304_p8), %s2175_s7, 16  }
0x143a   : > { %2475 = vsyncadd (%p2304_p8), %s2175_s7, 4294967280  ;;  %s3565_s30 = sld [smem:[#allocation10_spill]]  ;;  %s3568_s29 = smov %s2482_s2 }
0x143b   : > { %s3566_s6 = sld [smem:[#allocation8_spill]] }
0x143c   : > { %s3567_s1 = sld [smem:[#allocation11_spill]] }
0x1440   : > { %p35_p9 = scmp.ge.s32.totalorder %s3565_s30, 4  }
0x1441   : > { %s3569_s2 = smov %s3566_s6 }
0x1442   : > { %s3570_s6 = smov %s3567_s1  ;;  %37 = sbr.rel (!%p35_p9) target bundleno = 18 (0x12), region = 169 }
0x1447   :  { %2180 = vsyncpa [#allocation5], 1 }
0x1448   :  { %2182 = vsyncpa [#allocation5 + $0x1], 1 }

</bundles_post_ra>
